<compile_context>
chip_gen: v7x
topology: tpu7x:2x2x1
jax: 0.10.0
libtpu: 0.0.40
codegen_flags: <defaults>
</compile_context>

<pallas_src>
import functools

import jax
import jax.numpy as jnp
import numpy as np
from jax.experimental import pallas as pl
from jax.experimental.pallas import tpu as pltpu

LANES = 128   # lane-dense activation width
HALF = 64     # lane offset of the second block (log_var head / policy branch)


# -----------------------------------------------------------------------------
# Kernel
# -----------------------------------------------------------------------------
def _vae_forward_kernel(x_ref, eps_ref, noise_ref, w_ref, b_ref, out_ref, *,
                        obs_dim, num_categories):
    # x_ref    : (B, obs_dim)   f32
    # eps_ref  : (B, 128)       f32  N(0,1); only lanes [0:latent_dim) are used
    # noise_ref: (B, 128)       f32  N(0,1); only lanes [0:latent_dim) are used
    # w_ref    : (9, 128, 128)  bf16 packed/fused weights (see pack_params)
    # b_ref    : (9, 1, 128)    f32  packed biases
    # out_ref  : (3, B, 128)    f32
    #   plane 0: feature                lanes [0:feature_dim)
    #   plane 1: mean | clipped log_var lanes [0:latent_dim) | [64:64+latent_dim)
    #   plane 2: obs | policy_obs       lanes [0:feature_dim) | [64:64+feature_dim)
    batch = x_ref.shape[0]
    lanes = w_ref.shape[-1]

    def lin(h, i):
        # bf16 operands, f32 accumulate -> single-pass MXU per stage
        return jnp.dot(h.astype(jnp.bfloat16), w_ref[i],
                       preferred_element_type=jnp.float32) + b_ref[i]

    def relu(v):
        return jnp.maximum(v, 0.0)

    # ---- feature layer (narrow K = obs_dim, lane-dense 128-wide output) ----
    feature = jnp.dot(x_ref[...].astype(jnp.bfloat16), w_ref[0, :obs_dim, :],
                      preferred_element_type=jnp.float32) + b_ref[0]
    out_ref[0] = feature                      # early store: bounds live range

    # ---- encoder (final layer = merged mean / log_var head) ----
    h = relu(lin(feature, 1))
    h = relu(lin(h, 2))
    h = relu(lin(h, 3))
    h5 = lin(h, 4)        # mean head in lanes [0:64), log_var head in [64:128)

    lane = jax.lax.broadcasted_iota(jnp.int32, (batch, lanes), 1)
    latent = jnp.where(lane < HALF, h5, jnp.clip(h5, -10.0, 10.0))
    out_ref[1] = latent                       # early store

    # ---- reparameterization trick (rsample) ----
    # roll by 64 on 128 lanes swaps halves: clipped log_var -> lanes [0:64)
    log_var = pltpu.roll(latent, shift=HALF, axis=1)
    std = jnp.exp(0.5 * log_var)
    sample = latent + std * eps_ref[...]      # lanes [0:latent_dim) are real

    # ---- continuous latent space: discretize -> bin centers -> + noise ----
    # Pure f32 floor + clip matches torch .long() + clamp after the clip.
    k = float(num_categories)
    z_scaled = (sample + 1.0) * (0.5 * k)
    z_discrete = jnp.clip(jnp.floor(z_scaled), 0.0, k - 1.0)
    z_cont = -1.0 + (z_discrete + 0.5) * (2.0 / k) + noise_ref[...] * 0.01

    # ---- block-diagonal fused decoder (lanes [0:64)) + policy decoder ----
    # Junk lanes of `sample` / `z_cont` only hit all-zero weight rows.
    dec_in = jnp.where(lane < HALF, sample,
                       pltpu.roll(z_cont, shift=HALF, axis=1))
    hd = relu(lin(dec_in, 5))
    hd = relu(lin(hd, 6))
    hd = relu(lin(hd, 7))
    out_ref[2] = lin(hd, 8)                   # obs | policy_obs


# -----------------------------------------------------------------------------
# Parameter init (deterministic, synthetic, matches nn.Linear default init)
# -----------------------------------------------------------------------------
def _init_linear(key, fan_in, fan_out):
    kw, kb = jax.random.split(key)
    scale = 1.0 / np.sqrt(float(fan_in))
    w = jax.random.uniform(kw, (fan_in, fan_out), jnp.float32, -scale, scale)
    b = jax.random.uniform(kb, (fan_out,), jnp.float32, -scale, scale)
    return w, b


def init_vae_params(key, obs_dim, feature_dim, latent_dim):
    """Returns the 13 torch linear layers as (w, b) pairs, w = (fan_in, fan_out)."""
    f, l = feature_dim, latent_dim
    enc = [(f, f // 2), (f // 2, f // 4), (f // 4, f // 8), (f // 8, 2 * l)]
    dec = [(l, 2 * l), (2 * l, 4 * l), (4 * l, 8 * l), (8 * l, f)]
    dims = [(obs_dim, f)] + enc + dec + dec
    keys = jax.random.split(key, len(dims))
    return [_init_linear(k, fi, fo) for k, (fi, fo) in zip(keys, dims)]


def pack_params(layers, latent_dim, feature_dim):
    """Pack the 13 torch layers into 9 fused bf16 matmul stages (done once)."""
    assert len(layers) == 13
    assert feature_dim <= HALF and 8 * latent_dim <= HALF and 2 * latent_dim <= HALF
    n_stages = 9
    w_slab = np.zeros((n_stages, LANES, LANES), np.float32)
    b_slab = np.zeros((n_stages, 1, LANES), np.float32)

    def put(stage, w, b, r0, c0):
        fi, fo = np.asarray(w).shape
        assert r0 + fi <= LANES and c0 + fo <= LANES
        w_slab[stage, r0:r0 + fi, c0:c0 + fo] = np.asarray(w)
        b_slab[stage, 0, c0:c0 + fo] = np.asarray(b)

    for s in range(4):                        # feature layer + encoder[0:3]
        w, b = layers[s]
        put(s, w, b, 0, 0)
    w4, b4 = layers[4]                        # encoder final -> merged heads
    l = latent_dim
    put(4, w4[:, :l], b4[:l], 0, 0)           # mean head  -> lanes [0:l)
    put(4, w4[:, l:], b4[l:], 0, HALF)        # logvar head-> lanes [64:64+l)
    for s in range(4):                        # block-diagonal dec || policy
        wd, bd = layers[5 + s]
        wp, bp = layers[9 + s]
        put(5 + s, wd, bd, 0, 0)
        put(5 + s, wp, bp, HALF, HALF)
    return jnp.asarray(w_slab, jnp.bfloat16), jnp.asarray(b_slab, jnp.float32)


# -----------------------------------------------------------------------------
# Wrapper
# -----------------------------------------------------------------------------
def vae_forward(x, eps, noise, w_slab, b_slab, *, obs_dim, feature_dim,
                latent_dim, num_categories):
    batch = x.shape[0]
    lanes = w_slab.shape[-1]
    n_stages = w_slab.shape[0]

    cost = pl.CostEstimate(
        flops=2 * n_stages * batch * lanes * lanes,
        transcendentals=batch * lanes,
        bytes_accessed=(4 * (x.size + eps.size + noise.size
                             + 3 * batch * lanes + b_slab.size)
                        + 2 * w_slab.size),
    )

    kernel = functools.partial(_vae_forward_kernel, obs_dim=obs_dim,
                               num_categories=num_categories)
    vmem = pl.BlockSpec(memory_space=pltpu.MemorySpace.VMEM)

    # Single gridless launch: whole working set (~0.7 MB) lives in VMEM.
    # TODO(synk): if the deployment batch grows >= 256, add a batch grid with
    # dimension_semantics=("parallel",) to use both TensorCores on v7x.
    out = pl.pallas_call(
        kernel,
        out_shape=jax.ShapeDtypeStruct((3, batch, lanes), jnp.float32),
        in_specs=[vmem, vmem, vmem, vmem, vmem],
        out_specs=vmem,
        cost_estimate=cost,
    )(x, eps, noise, w_slab, b_slab)

    feature = out[0, :, :feature_dim]
    mean = out[1, :, :latent_dim]
    log_var = out[1, :, HALF:HALF + latent_dim]
    obs = out[2, :, :feature_dim]
    policy_obs = out[2, :, HALF:HALF + feature_dim]
    return feature, obs, policy_obs, mean, log_var


# -----------------------------------------------------------------------------
# Pure-JAX reference (mirrors the torch forward; same bf16-operand matmuls)
# -----------------------------------------------------------------------------
def _vae_forward_ref(x, eps, noise, layers, num_categories):
    def lin(h, layer):
        w, b = layer
        return jnp.dot(h.astype(jnp.bfloat16), w.astype(jnp.bfloat16),
                       preferred_element_type=jnp.float32) + b

    relu = lambda v: jnp.maximum(v, 0.0)
    feature = lin(x, layers[0])
    h = relu(lin(feature, layers[1]))
    h = relu(lin(h, layers[2]))
    h = relu(lin(h, layers[3]))
    latent_param = lin(h, layers[4])
    l = latent_param.shape[-1] // 2
    mean = latent_param[:, :l]
    log_var = jnp.clip(latent_param[:, l:], -10.0, 10.0)
    std = jnp.exp(0.5 * log_var)
    sample = mean + std * eps
    h = relu(lin(sample, layers[5]))
    h = relu(lin(h, layers[6]))
    h = relu(lin(h, layers[7]))
    obs = lin(h, layers[8])
    k = float(num_categories)
    zd = jnp.clip(jnp.floor((sample + 1.0) * 0.5 * k), 0.0, k - 1.0)
    zc = -1.0 + (zd + 0.5) * (2.0 / k) + noise * 0.01
    h = relu(lin(zc, layers[9]))
    h = relu(lin(h, layers[10]))
    h = relu(lin(h, layers[11]))
    policy_obs = lin(h, layers[12])
    return feature, obs, policy_obs, mean, log_var


# -----------------------------------------------------------------------------
# Main
# -----------------------------------------------------------------------------
if __name__ == "__main__":
    config = {
        "input_dim": 16,      # obs_dim
        "feature_dim": 32,    # divisible by 8 (encoder //8)
        "latent_dim": 4,
        "num_categories": 8,
        "lr": 1e-3,
    }
    batch = 128  # full (8,128)-aligned activations; still only ~0.7 MB of VMEM

    key = jax.random.PRNGKey(0)
    k_x, k_eps, k_noise, k_params = jax.random.split(key, 4)

    x = jax.random.normal(k_x, (batch, config["input_dim"]), jnp.float32)
    # randomness for rsample / latent noise, generated lane-dense so the kernel
    # needs no padding; only lanes [0:latent_dim) are consumed.
    eps = jax.random.normal(k_eps, (batch, LANES), jnp.float32)
    noise = jax.random.normal(k_noise, (batch, LANES), jnp.float32)

    layers = init_vae_params(k_params, config["input_dim"],
                             config["feature_dim"], config["latent_dim"])
    w_slab, b_slab = pack_params(layers, config["latent_dim"],
                                 config["feature_dim"])

    fwd = jax.jit(functools.partial(
        vae_forward,
        obs_dim=config["input_dim"],
        feature_dim=config["feature_dim"],
        latent_dim=config["latent_dim"],
        num_categories=config["num_categories"],
    ))

    feature, obs, policy_obs, mean, log_var = fwd(x, eps, noise, w_slab, b_slab)
    jax.block_until_ready((feature, obs, policy_obs, mean, log_var))

    # shape checks
    assert feature.shape == (batch, config["feature_dim"])
    assert obs.shape == (batch, config["feature_dim"])
    assert policy_obs.shape == (batch, config["feature_dim"])
    assert mean.shape == (batch, config["latent_dim"])
    assert log_var.shape == (batch, config["latent_dim"])

    # numeric check against the pure-JAX reference (same bf16-at-dot precision)
    l = config["latent_dim"]
    r_feat, r_obs, r_pol, r_mean, r_lv = _vae_forward_ref(
        x, eps[:, :l], noise[:, :l], layers, config["num_categories"])
    for got, want in ((feature, r_feat), (obs, r_obs),
                      (mean, r_mean), (log_var, r_lv)):
        np.testing.assert_allclose(np.asarray(got), np.asarray(want),
                                   rtol=5e-3, atol=5e-3)
    # policy_obs goes through floor-based binning; a bin can flip at an exact
    # bin edge under tiny matmul rounding differences, so only sanity-check it.
    assert policy_obs.shape == r_pol.shape
    assert bool(jnp.all(jnp.isfinite(policy_obs)))

    print("KERNEL_OK")
</pallas_src>

<mosaic_0001>
module attributes {stable_mosaic.version = 11 : i64} {
  func.func @_vae_forward_kernel(%arg0: memref<128x16xf32, #tpu.memory_space<vmem>>, %arg1: memref<128x128xf32, #tpu.memory_space<vmem>>, %arg2: memref<128x128xf32, #tpu.memory_space<vmem>>, %arg3: memref<9x128x128xbf16, #tpu.memory_space<vmem>>, %arg4: memref<9x1x128xf32, #tpu.memory_space<vmem>>, %arg5: memref<3x128x128xf32, #tpu.memory_space<vmem>>) attributes {dimension_semantics = [], scalar_prefetch = 0 : i64, scratch_operands = 0 : i64, tpu.core_type = #tpu.core_type<tc>} {
    %c0 = arith.constant 0 : index
    %c0_0 = arith.constant 0 : index
    %0 = vector.load %arg0[%c0, %c0_0] : memref<128x16xf32, #tpu.memory_space<vmem>>, vector<128x16xf32>
    %1 = arith.truncf %0 : vector<128x16xf32> to vector<128x16xbf16>
    %c0_1 = arith.constant 0 : index
    %c0_2 = arith.constant 0 : index
    %c0_3 = arith.constant 0 : index
    %2 = vector.load %arg3[%c0_1, %c0_2, %c0_3] : memref<9x128x128xbf16, #tpu.memory_space<vmem>>, vector<1x16x128xbf16>
    %3 = vector.shape_cast %2 : vector<1x16x128xbf16> to vector<16x128xbf16>
    %cst = arith.constant dense<0.000000e+00> : vector<128x128xf32>
    %4 = tpu.matmul %1, %3, %cst {dimension_numbers = #tpu.dot_dimension_numbers<[1], [0], [0], [1], [0, 0, 1, 1], [], []>} : vector<128x16xbf16>, vector<16x128xbf16>, vector<128x128xf32> -> vector<128x128xf32>
    %c0_4 = arith.constant 0 : index
    %c0_5 = arith.constant 0 : index
    %c0_6 = arith.constant 0 : index
    %5 = vector.load %arg4[%c0_4, %c0_5, %c0_6] : memref<9x1x128xf32, #tpu.memory_space<vmem>>, vector<1x1x128xf32>
    %6 = vector.shape_cast %5 : vector<1x1x128xf32> to vector<1x128xf32>
    %7 = vector.broadcast %6 : vector<1x128xf32> to vector<128x128xf32>
    %8 = arith.addf %4, %7 : vector<128x128xf32>
    %c0_7 = arith.constant 0 : index
    %c0_8 = arith.constant 0 : index
    %c0_9 = arith.constant 0 : index
    %9 = vector.load %arg5[%c0_7, %c0_8, %c0_9] : memref<3x128x128xf32, #tpu.memory_space<vmem>>, vector<1x128x128xf32>
    %10 = vector.shape_cast %9 : vector<1x128x128xf32> to vector<128x128xf32>
    %11 = vector.shape_cast %8 : vector<128x128xf32> to vector<1x128x128xf32>
    tpu.vector_store %arg5[%c0_7, %c0_8, %c0_9], %11 {strides = array<i32>} : memref<3x128x128xf32, #tpu.memory_space<vmem>>, vector<1x128x128xf32>,
    %12 = arith.truncf %8 : vector<128x128xf32> to vector<128x128xbf16>
    %c1 = arith.constant 1 : index
    %c0_10 = arith.constant 0 : index
    %c0_11 = arith.constant 0 : index
    %13 = vector.load %arg3[%c1, %c0_10, %c0_11] : memref<9x128x128xbf16, #tpu.memory_space<vmem>>, vector<1x128x128xbf16>
    %14 = vector.shape_cast %13 : vector<1x128x128xbf16> to vector<128x128xbf16>
    %cst_12 = arith.constant dense<0.000000e+00> : vector<128x128xf32>
    %15 = tpu.matmul %12, %14, %cst_12 {dimension_numbers = #tpu.dot_dimension_numbers<[1], [0], [0], [1], [0, 0, 1, 1], [], []>} : vector<128x128xbf16>, vector<128x128xbf16>, vector<128x128xf32> -> vector<128x128xf32>
    %c1_13 = arith.constant 1 : index
    %c0_14 = arith.constant 0 : index
    %c0_15 = arith.constant 0 : index
    %16 = vector.load %arg4[%c1_13, %c0_14, %c0_15] : memref<9x1x128xf32, #tpu.memory_space<vmem>>, vector<1x1x128xf32>
    %17 = vector.shape_cast %16 : vector<1x1x128xf32> to vector<1x128xf32>
    %18 = vector.broadcast %17 : vector<1x128xf32> to vector<128x128xf32>
    %19 = arith.addf %15, %18 : vector<128x128xf32>
    %cst_16 = arith.constant 0.000000e+00 : f32
    %20 = vector.broadcast %cst_16 : f32 to vector<128x128xf32>
    %21 = arith.maximumf %19, %20 : vector<128x128xf32>
    %22 = arith.truncf %21 : vector<128x128xf32> to vector<128x128xbf16>
    %c2 = arith.constant 2 : index
    %c0_17 = arith.constant 0 : index
    %c0_18 = arith.constant 0 : index
    %23 = vector.load %arg3[%c2, %c0_17, %c0_18] : memref<9x128x128xbf16, #tpu.memory_space<vmem>>, vector<1x128x128xbf16>
    %24 = vector.shape_cast %23 : vector<1x128x128xbf16> to vector<128x128xbf16>
    %cst_19 = arith.constant dense<0.000000e+00> : vector<128x128xf32>
    %25 = tpu.matmul %22, %24, %cst_19 {dimension_numbers = #tpu.dot_dimension_numbers<[1], [0], [0], [1], [0, 0, 1, 1], [], []>} : vector<128x128xbf16>, vector<128x128xbf16>, vector<128x128xf32> -> vector<128x128xf32>
    %c2_20 = arith.constant 2 : index
    %c0_21 = arith.constant 0 : index
    %c0_22 = arith.constant 0 : index
    %26 = vector.load %arg4[%c2_20, %c0_21, %c0_22] : memref<9x1x128xf32, #tpu.memory_space<vmem>>, vector<1x1x128xf32>
    %27 = vector.shape_cast %26 : vector<1x1x128xf32> to vector<1x128xf32>
    %28 = vector.broadcast %27 : vector<1x128xf32> to vector<128x128xf32>
    %29 = arith.addf %25, %28 : vector<128x128xf32>
    %cst_23 = arith.constant 0.000000e+00 : f32
    %30 = vector.broadcast %cst_23 : f32 to vector<128x128xf32>
    %31 = arith.maximumf %29, %30 : vector<128x128xf32>
    %32 = arith.truncf %31 : vector<128x128xf32> to vector<128x128xbf16>
    %c3 = arith.constant 3 : index
    %c0_24 = arith.constant 0 : index
    %c0_25 = arith.constant 0 : index
    %33 = vector.load %arg3[%c3, %c0_24, %c0_25] : memref<9x128x128xbf16, #tpu.memory_space<vmem>>, vector<1x128x128xbf16>
    %34 = vector.shape_cast %33 : vector<1x128x128xbf16> to vector<128x128xbf16>
    %cst_26 = arith.constant dense<0.000000e+00> : vector<128x128xf32>
    %35 = tpu.matmul %32, %34, %cst_26 {dimension_numbers = #tpu.dot_dimension_numbers<[1], [0], [0], [1], [0, 0, 1, 1], [], []>} : vector<128x128xbf16>, vector<128x128xbf16>, vector<128x128xf32> -> vector<128x128xf32>
    %c3_27 = arith.constant 3 : index
    %c0_28 = arith.constant 0 : index
    %c0_29 = arith.constant 0 : index
    %36 = vector.load %arg4[%c3_27, %c0_28, %c0_29] : memref<9x1x128xf32, #tpu.memory_space<vmem>>, vector<1x1x128xf32>
    %37 = vector.shape_cast %36 : vector<1x1x128xf32> to vector<1x128xf32>
    %38 = vector.broadcast %37 : vector<1x128xf32> to vector<128x128xf32>
    %39 = arith.addf %35, %38 : vector<128x128xf32>
    %cst_30 = arith.constant 0.000000e+00 : f32
    %40 = vector.broadcast %cst_30 : f32 to vector<128x128xf32>
    %41 = arith.maximumf %39, %40 : vector<128x128xf32>
    %42 = arith.truncf %41 : vector<128x128xf32> to vector<128x128xbf16>
    %c4 = arith.constant 4 : index
    %c0_31 = arith.constant 0 : index
    %c0_32 = arith.constant 0 : index
    %43 = vector.load %arg3[%c4, %c0_31, %c0_32] : memref<9x128x128xbf16, #tpu.memory_space<vmem>>, vector<1x128x128xbf16>
    %44 = vector.shape_cast %43 : vector<1x128x128xbf16> to vector<128x128xbf16>
    %cst_33 = arith.constant dense<0.000000e+00> : vector<128x128xf32>
    %45 = tpu.matmul %42, %44, %cst_33 {dimension_numbers = #tpu.dot_dimension_numbers<[1], [0], [0], [1], [0, 0, 1, 1], [], []>} : vector<128x128xbf16>, vector<128x128xbf16>, vector<128x128xf32> -> vector<128x128xf32>
    %c4_34 = arith.constant 4 : index
    %c0_35 = arith.constant 0 : index
    %c0_36 = arith.constant 0 : index
    %46 = vector.load %arg4[%c4_34, %c0_35, %c0_36] : memref<9x1x128xf32, #tpu.memory_space<vmem>>, vector<1x1x128xf32>
    %47 = vector.shape_cast %46 : vector<1x1x128xf32> to vector<1x128xf32>
    %48 = vector.broadcast %47 : vector<1x128xf32> to vector<128x128xf32>
    %49 = arith.addf %45, %48 : vector<128x128xf32>
    %50 = tpu.iota {dimensions = array<i32: 1>} : vector<128x128xi32>
    %c64_i32 = arith.constant 64 : i32
    %51 = vector.broadcast %c64_i32 : i32 to vector<128x128xi32>
    %52 = arith.cmpi slt, %50, %51 : vector<128x128xi32>
    %cst_37 = arith.constant -1.000000e+01 : f32
    %cst_38 = arith.constant 1.000000e+01 : f32
    %53 = vector.broadcast %cst_37 : f32 to vector<128x128xf32>
    %54 = arith.maximumf %53, %49 : vector<128x128xf32>
    %55 = vector.broadcast %cst_38 : f32 to vector<128x128xf32>
    %56 = arith.minimumf %55, %54 : vector<128x128xf32>
    %57 = arith.select %52, %49, %56 : vector<128x128xi1>, vector<128x128xf32>
    %c1_39 = arith.constant 1 : index
    %c0_40 = arith.constant 0 : index
    %c0_41 = arith.constant 0 : index
    %58 = vector.load %arg5[%c1_39, %c0_40, %c0_41] : memref<3x128x128xf32, #tpu.memory_space<vmem>>, vector<1x128x128xf32>
    %59 = vector.shape_cast %58 : vector<1x128x128xf32> to vector<128x128xf32>
    %60 = vector.shape_cast %57 : vector<128x128xf32> to vector<1x128x128xf32>
    tpu.vector_store %arg5[%c1_39, %c0_40, %c0_41], %60 {strides = array<i32>} : memref<3x128x128xf32, #tpu.memory_space<vmem>>, vector<1x128x128xf32>,
    %c64_i32_42 = arith.constant 64 : i32
    %61 = tpu.dynamic_rotate %57 by %c64_i32_42 dim 1 : vector<128x128xf32>, i32 -> vector<128x128xf32>
    %cst_43 = arith.constant 5.000000e-01 : f32
    %62 = vector.broadcast %cst_43 : f32 to vector<128x128xf32>
    %63 = arith.mulf %62, %61 : vector<128x128xf32>
    %64 = math.exp %63 : vector<128x128xf32>
    %c0_44 = arith.constant 0 : index
    %c0_45 = arith.constant 0 : index
    %65 = vector.load %arg1[%c0_44, %c0_45] : memref<128x128xf32, #tpu.memory_space<vmem>>, vector<128x128xf32>
    %66 = arith.mulf %64, %65 : vector<128x128xf32>
    %67 = arith.addf %57, %66 : vector<128x128xf32>
    %cst_46 = arith.constant 1.000000e+00 : f32
    %68 = vector.broadcast %cst_46 : f32 to vector<128x128xf32>
    %69 = arith.addf %67, %68 : vector<128x128xf32>
    %cst_47 = arith.constant 4.000000e+00 : f32
    %70 = vector.broadcast %cst_47 : f32 to vector<128x128xf32>
    %71 = arith.mulf %69, %70 : vector<128x128xf32>
    %72 = math.floor %71 : vector<128x128xf32>
    %cst_48 = arith.constant 0.000000e+00 : f32
    %cst_49 = arith.constant 7.000000e+00 : f32
    %73 = vector.broadcast %cst_48 : f32 to vector<128x128xf32>
    %74 = arith.maximumf %73, %72 : vector<128x128xf32>
    %75 = vector.broadcast %cst_49 : f32 to vector<128x128xf32>
    %76 = arith.minimumf %75, %74 : vector<128x128xf32>
    %cst_50 = arith.constant 5.000000e-01 : f32
    %77 = vector.broadcast %cst_50 : f32 to vector<128x128xf32>
    %78 = arith.addf %76, %77 : vector<128x128xf32>
    %cst_51 = arith.constant 2.500000e-01 : f32
    %79 = vector.broadcast %cst_51 : f32 to vector<128x128xf32>
    %80 = arith.mulf %78, %79 : vector<128x128xf32>
    %cst_52 = arith.constant -1.000000e+00 : f32
    %81 = vector.broadcast %cst_52 : f32 to vector<128x128xf32>
    %82 = arith.addf %81, %80 : vector<128x128xf32>
    %c0_53 = arith.constant 0 : index
    %c0_54 = arith.constant 0 : index
    %83 = vector.load %arg2[%c0_53, %c0_54] : memref<128x128xf32, #tpu.memory_space<vmem>>, vector<128x128xf32>
    %cst_55 = arith.constant 0.00999999977 : f32
    %84 = vector.broadcast %cst_55 : f32 to vector<128x128xf32>
    %85 = arith.mulf %83, %84 : vector<128x128xf32>
    %86 = arith.addf %82, %85 : vector<128x128xf32>
    %c64_i32_56 = arith.constant 64 : i32
    %87 = vector.broadcast %c64_i32_56 : i32 to vector<128x128xi32>
    %88 = arith.cmpi slt, %50, %87 : vector<128x128xi32>
    %c64_i32_57 = arith.constant 64 : i32
    %89 = tpu.dynamic_rotate %86 by %c64_i32_57 dim 1 : vector<128x128xf32>, i32 -> vector<128x128xf32>
    %90 = arith.select %88, %67, %89 : vector<128x128xi1>, vector<128x128xf32>
    %91 = arith.truncf %90 : vector<128x128xf32> to vector<128x128xbf16>
    %c5 = arith.constant 5 : index
    %c0_58 = arith.constant 0 : index
    %c0_59 = arith.constant 0 : index
    %92 = vector.load %arg3[%c5, %c0_58, %c0_59] : memref<9x128x128xbf16, #tpu.memory_space<vmem>>, vector<1x128x128xbf16>
    %93 = vector.shape_cast %92 : vector<1x128x128xbf16> to vector<128x128xbf16>
    %cst_60 = arith.constant dense<0.000000e+00> : vector<128x128xf32>
    %94 = tpu.matmul %91, %93, %cst_60 {dimension_numbers = #tpu.dot_dimension_numbers<[1], [0], [0], [1], [0, 0, 1, 1], [], []>} : vector<128x128xbf16>, vector<128x128xbf16>, vector<128x128xf32> -> vector<128x128xf32>
    %c5_61 = arith.constant 5 : index
    %c0_62 = arith.constant 0 : index
    %c0_63 = arith.constant 0 : index
    %95 = vector.load %arg4[%c5_61, %c0_62, %c0_63] : memref<9x1x128xf32, #tpu.memory_space<vmem>>, vector<1x1x128xf32>
    %96 = vector.shape_cast %95 : vector<1x1x128xf32> to vector<1x128xf32>
    %97 = vector.broadcast %96 : vector<1x128xf32> to vector<128x128xf32>
    %98 = arith.addf %94, %97 : vector<128x128xf32>
    %cst_64 = arith.constant 0.000000e+00 : f32
    %99 = vector.broadcast %cst_64 : f32 to vector<128x128xf32>
    %100 = arith.maximumf %98, %99 : vector<128x128xf32>
    %101 = arith.truncf %100 : vector<128x128xf32> to vector<128x128xbf16>
    %c6 = arith.constant 6 : index
    %c0_65 = arith.constant 0 : index
    %c0_66 = arith.constant 0 : index
    %102 = vector.load %arg3[%c6, %c0_65, %c0_66] : memref<9x128x128xbf16, #tpu.memory_space<vmem>>, vector<1x128x128xbf16>
    %103 = vector.shape_cast %102 : vector<1x128x128xbf16> to vector<128x128xbf16>
    %cst_67 = arith.constant dense<0.000000e+00> : vector<128x128xf32>
    %104 = tpu.matmul %101, %103, %cst_67 {dimension_numbers = #tpu.dot_dimension_numbers<[1], [0], [0], [1], [0, 0, 1, 1], [], []>} : vector<128x128xbf16>, vector<128x128xbf16>, vector<128x128xf32> -> vector<128x128xf32>
    %c6_68 = arith.constant 6 : index
    %c0_69 = arith.constant 0 : index
    %c0_70 = arith.constant 0 : index
    %105 = vector.load %arg4[%c6_68, %c0_69, %c0_70] : memref<9x1x128xf32, #tpu.memory_space<vmem>>, vector<1x1x128xf32>
    %106 = vector.shape_cast %105 : vector<1x1x128xf32> to vector<1x128xf32>
    %107 = vector.broadcast %106 : vector<1x128xf32> to vector<128x128xf32>
    %108 = arith.addf %104, %107 : vector<128x128xf32>
    %cst_71 = arith.constant 0.000000e+00 : f32
    %109 = vector.broadcast %cst_71 : f32 to vector<128x128xf32>
    %110 = arith.maximumf %108, %109 : vector<128x128xf32>
    %111 = arith.truncf %110 : vector<128x128xf32> to vector<128x128xbf16>
    %c7 = arith.constant 7 : index
    %c0_72 = arith.constant 0 : index
    %c0_73 = arith.constant 0 : index
    %112 = vector.load %arg3[%c7, %c0_72, %c0_73] : memref<9x128x128xbf16, #tpu.memory_space<vmem>>, vector<1x128x128xbf16>
    %113 = vector.shape_cast %112 : vector<1x128x128xbf16> to vector<128x128xbf16>
    %cst_74 = arith.constant dense<0.000000e+00> : vector<128x128xf32>
    %114 = tpu.matmul %111, %113, %cst_74 {dimension_numbers = #tpu.dot_dimension_numbers<[1], [0], [0], [1], [0, 0, 1, 1], [], []>} : vector<128x128xbf16>, vector<128x128xbf16>, vector<128x128xf32> -> vector<128x128xf32>
    %c7_75 = arith.constant 7 : index
    %c0_76 = arith.constant 0 : index
    %c0_77 = arith.constant 0 : index
    %115 = vector.load %arg4[%c7_75, %c0_76, %c0_77] : memref<9x1x128xf32, #tpu.memory_space<vmem>>, vector<1x1x128xf32>
    %116 = vector.shape_cast %115 : vector<1x1x128xf32> to vector<1x128xf32>
    %117 = vector.broadcast %116 : vector<1x128xf32> to vector<128x128xf32>
    %118 = arith.addf %114, %117 : vector<128x128xf32>
    %cst_78 = arith.constant 0.000000e+00 : f32
    %119 = vector.broadcast %cst_78 : f32 to vector<128x128xf32>
    %120 = arith.maximumf %118, %119 : vector<128x128xf32>
    %121 = arith.truncf %120 : vector<128x128xf32> to vector<128x128xbf16>
    %c8 = arith.constant 8 : index
    %c0_79 = arith.constant 0 : index
    %c0_80 = arith.constant 0 : index
    %122 = vector.load %arg3[%c8, %c0_79, %c0_80] : memref<9x128x128xbf16, #tpu.memory_space<vmem>>, vector<1x128x128xbf16>
    %123 = vector.shape_cast %122 : vector<1x128x128xbf16> to vector<128x128xbf16>
    %cst_81 = arith.constant dense<0.000000e+00> : vector<128x128xf32>
    %124 = tpu.matmul %121, %123, %cst_81 {dimension_numbers = #tpu.dot_dimension_numbers<[1], [0], [0], [1], [0, 0, 1, 1], [], []>} : vector<128x128xbf16>, vector<128x128xbf16>, vector<128x128xf32> -> vector<128x128xf32>
    %c8_82 = arith.constant 8 : index
    %c0_83 = arith.constant 0 : index
    %c0_84 = arith.constant 0 : index
    %125 = vector.load %arg4[%c8_82, %c0_83, %c0_84] : memref<9x1x128xf32, #tpu.memory_space<vmem>>, vector<1x1x128xf32>
    %126 = vector.shape_cast %125 : vector<1x1x128xf32> to vector<1x128xf32>
    %127 = vector.broadcast %126 : vector<1x128xf32> to vector<128x128xf32>
    %128 = arith.addf %124, %127 : vector<128x128xf32>
    %c2_85 = arith.constant 2 : index
    %c0_86 = arith.constant 0 : index
    %c0_87 = arith.constant 0 : index
    %129 = vector.load %arg5[%c2_85, %c0_86, %c0_87] : memref<3x128x128xf32, #tpu.memory_space<vmem>>, vector<1x128x128xf32>
    %130 = vector.shape_cast %129 : vector<1x128x128xf32> to vector<128x128xf32>
    %131 = vector.shape_cast %128 : vector<128x128xf32> to vector<1x128x128xf32>
    tpu.vector_store %arg5[%c2_85, %c0_86, %c0_87], %131 {strides = array<i32>} : memref<3x128x128xf32, #tpu.memory_space<vmem>>, vector<1x128x128xf32>,
    return
  }
}

</mosaic_0001>

<bundles_post_ra>
// kernel: vae_forward.1
= control target key start
LH: loop header
LB: loop body
LE: loop exit
PB: predicated region body
PF: predicated region fallthrough
CT: control target
= control target key end

     0   :  { %10 = vsyncpa [#allocation3], 0  ;;  %s3552_s0 = inlined_call_operand.vmem [shape: f32[128,16], index: 0, kind: input, shape index: {}]   ;;  %s3553_s1 = inlined_call_operand.vmem [shape: f32[128,128], index: 1, kind: input, shape index: {}]   ;;  %s3554_s2 = inlined_call_operand.hbm [shape: f32[128,128], index: 2, kind: input, shape index: {}]   ;;  %s3555_s3 = inlined_call_operand.hbm [shape: bf16[9,128,128], index: 3, kind: input, shape index: {}]   ;;  %s3556_s4 = inlined_call_operand.vmem [shape: f32[9,1,128], index: 4, kind: input, shape index: {}]   ;;  %s3557_s5 = inlined_call_operand.vmem [shape: f32[3,128,128], index: 5, kind: output, shape index: {}]  }
   0x1   :  { %11 = vsyncpa [#allocation5], 0  ;;  %s2929_s18 = smov [#allocation2]   ;;  %s2881_s22 = scalar_lea.hbm %s3554_s2, 2048 }
   0x2   :  { %s21_s19 = sshll.u32 %s2929_s18, 4  ;;  %p2882_p0 = scmp.ne.s32.totalorder %s3554_s2, %s2881_s22  ;;  %s22_s19 = int_to_ptr.vmem [resolvable:$true] %s21_s19 }
   0x3   :  { %p2885_p1 = scmp.lt.u32.totalorder %s2881_s22, %s3554_s2 }
   0x5   :  { %p2887_p2 = pnand %p2885_p1, %p2882_p0 }
   0x7   :  { %2890 = shalt.err (!%p2887_p2)
}
   0x8   :  { %s2891_s27 = scalar_lea.vmem %s22_s19, 2048  ;;  %p2896_p4 = scmp.lt.s32.totalorder %s22_s19, %s22_s19 }
   0x9   :  { %p2892_p3 = scmp.ne.s32.totalorder %s22_s19, %s2891_s27  ;;  %p2897_p5 = scmp.lt.s32.totalorder %s2891_s27, %s2891_s27 }
   0xb   :  { %p2898_p6 = por %p2897_p5, %p2896_p4 }
   0xd   :  { %p2899_p7 = pnand %p2898_p6, %p2892_p3 }
   0xf   :  { %2902 = shalt.err (!%p2899_p7)
}
  0x10   :  { %s2930_s28 = smov 128   ;;  %s2931_s29 = smov 8  }
  0x11   :  { %27 = dma.hbm_to_vmem [thread:$0]  %s3554_s2, 2048, %s22_s19, [#allocation3], %s2930_s28, %s2930_s28, %s2931_s29  }
  0x12   :  { %s2932_s7 = smov [#allocation4]   ;;  %s2903_s11 = scalar_lea.hbm %s3555_s3, 9216 }
  0x13   :  { %s33_s8 = sshll.u32 %s2932_s7, 4  ;;  %p2904_p8 = scmp.ne.s32.totalorder %s3555_s3, %s2903_s11  ;;  %s34_s8 = int_to_ptr.vmem [resolvable:$true] %s33_s8 }
  0x14   :  { %p2907_p9 = scmp.lt.u32.totalorder %s2903_s11, %s3555_s3 }
  0x16   :  { %p2909_p10 = pnand %p2907_p9, %p2904_p8 }
  0x18   :  { %2912 = shalt.err (!%p2909_p10)
}
  0x19   :  { %s2913_s16 = scalar_lea.vmem %s34_s8, 9216  ;;  %p2918_p12 = scmp.lt.s32.totalorder %s34_s8, %s34_s8 }
  0x1a   :  { %p2914_p11 = scmp.ne.s32.totalorder %s34_s8, %s2913_s16  ;;  %p2919_p13 = scmp.lt.s32.totalorder %s2913_s16, %s2913_s16 }
  0x1c   :  { %p2920_p0 = por %p2919_p13, %p2918_p12 }
  0x1e   :  { %p2921_p1 = pnand %p2920_p0, %p2914_p11 }
  0x20   :  { %2924 = shalt.err (!%p2921_p1)
}
  0x21   :  { %s2933_s2 = smov 64   ;;  %s2934_s17 = smov 4  }
  0x22   :  { %39 = dma.hbm_to_vmem [thread:$0]  %s3555_s3, 9216, %s34_s8, [#allocation5], %s2933_s2, %s2933_s2, %s2934_s17  }
  0x23   :  { %2925 = dma.done.wait [#allocation3], 2048  }
  0x24   :  { %2926 = vsyncadd [#allocation3], 4294965248 }
  0x25   :  { %2927 = dma.done.wait [#allocation5], 9216  }
  0x26   :  { %2928 = vsyncadd [#allocation5], 4294958080  ;;  %v2784_v0 = vld [vmem:[#allocation4] sm:$0xff]   ;;  %v50_v2 = vld [vmem:[%s3552_s0 + $0x8] sm:$0xff]  ;;  %vm88_vm0 = vcmask 130048  }
  0x27   :  { %v49_v1 = vld [vmem:[%s3552_s0] sm:$0xff]  ;;  %v51_v3 = vld [vmem:[%s3552_s0 + $0x10] sm:$0xff]  ;;  %2464 = vmatprep.subr.bf16.mxu0 %v2784_v0  ;;  %v52_v5 = vld [vmem:[%s3552_s0 + $0x18] sm:$0xff] }
  0x28   :  { %v65_v4 = vpack.c.bf16 %v50_v2, %v49_v1  ;;  %v53_v6 = vld [vmem:[%s3552_s0 + $0x20] sm:$0xff]  ;;  %v54_v7 = vld [vmem:[%s3552_s0 + $0x28] sm:$0xff]  ;;  %2465 = vmatpush3.bf16.msra.mxu0 %v2784_v0  ;;  %v66_v8 = vpack.c.bf16 %v52_v5, %v51_v3  ;;  %v55_v10 = vld [vmem:[%s3552_s0 + $0x30] sm:$0xff] }
  0x29   :  { %v67_v9 = vpack.c.bf16 %v54_v7, %v53_v6  ;;  %v56_v11 = vld [vmem:[%s3552_s0 + $0x38] sm:$0xff]  ;;  %v57_v12 = vld [vmem:[%s3552_s0 + $0x40] sm:$0xff]  ;;  %v58_v13 = vld [vmem:[%s3552_s0 + $0x48] sm:$0xff] }
  0x2a   :  { %2466 = vmatprep.mubr.msk.bf16.mxu0 %vm88_vm0, %v65_v4  ;;  %v2785_v14 = vld [vmem:[#allocation4 + $0x40] sm:$0xff]   ;;  %v2786_v15 = vld [vmem:[#allocation4 + $0x48] sm:$0xff]   ;;  %v68_v16 = vpack.c.bf16 %v56_v11, %v55_v10  ;;  %v69_v17 = vpack.c.bf16 %v58_v13, %v57_v12  ;;  %v2787_v18 = vld [vmem:[#allocation4 + $0x50] sm:$0xff]  }
  0x2b   :  { %2467 = vmatmul.mubr.msk.bf16.vlgmr.msra.gmra.mrb[0].mxu0 %vm88_vm0, %v66_v8  ;;  %2482 = vmatprep.subr.bf16.mxu1 %v2785_v14  ;;  %v59_v19 = vld [vmem:[%s3552_s0 + $0x50] sm:$0xff]  ;;  %v60_v20 = vld [vmem:[%s3552_s0 + $0x58] sm:$0xff]  ;;  %v61_v22 = vld [vmem:[%s3552_s0 + $0x60] sm:$0xff] }
  0x2c   :  { %2470 = vmatprep.mubr.msk.bf16.mxu0 %vm88_vm0, %v67_v9  ;;  %2483 = vmatpush3.bf16.msra.mxu1 %v2785_v14  ;;  %v2788_v21 = vld [vmem:[#allocation4 + $0x58] sm:$0xff]   ;;  %v62_v23 = vld [vmem:[%s3552_s0 + $0x68] sm:$0xff]  ;;  %v2789_v24 = vld [vmem:[#allocation4 + $0x60] sm:$0xff]   ;;  %v70_v25 = vpack.c.bf16 %v60_v20, %v59_v19 }
  0x2d   :  { %2484 = vmatprep.subr.bf16.mxu1 %v2786_v15  ;;  %v71_v26 = vpack.c.bf16 %v62_v23, %v61_v22  ;;  %v63_v27 = vld [vmem:[%s3552_s0 + $0x70] sm:$0xff]  ;;  %v64_v28 = vld [vmem:[%s3552_s0 + $0x78] sm:$0xff]  ;;  %v2790_v29 = vld [vmem:[#allocation4 + $0x68] sm:$0xff]  }
  0x2e   :  { %v72_v30 = vpack.c.bf16 %v64_v28, %v63_v27  ;;  %v2791_v31 = vld [vmem:[#allocation4 + $0x70] sm:$0xff]   ;;  %v2792_v32 = vld [vmem:[#allocation4 + $0x78] sm:$0xff]   ;;  %v2793_v33 = vld [vmem:[#allocation4 + $0x80] sm:$0xff]  }
  0x2f   :  { %v2794_v34 = vld [vmem:[#allocation4 + $0x88] sm:$0xff]   ;;  %2514 = vmatprep.subr.bf16.mxu0 %v2793_v33  ;;  %v2795_v35 = vld [vmem:[#allocation4 + $0x90] sm:$0xff]   ;;  %v2796_v36 = vld [vmem:[#allocation4 + $0x98] sm:$0xff]  }
  0x30   :  { %2485 = vmatpush3.bf16.msra.mxu1 %v2786_v15  ;;  %2515 = vmatpush3.bf16.msra.mxu0 %v2793_v33  ;;  %v2797_v37 = vld [vmem:[#allocation4 + $0xa0] sm:$0xff]   ;;  %v2798_v38 = vld [vmem:[#allocation4 + $0xa8] sm:$0xff]   ;;  %v2803_v20 = vld [vmem:[#allocation4 + $0xd0] sm:$0xff]  }
  0x31   :  { %2486 = vmatprep.subr.bf16.mxu1 %v2787_v18  ;;  %2516 = vmatprep.subr.bf16.mxu0 %v2794_v34  ;;  %v2189_v39 = vld [vmem:[%s3556_s4] ss:$0 sm:$0xff]  ;;  %v2802_v19 = vld [vmem:[#allocation4 + $0xc8] sm:$0xff]  }
  0x32   :  { %v2805_v22 = vld [vmem:[#allocation4 + $0xe0] sm:$0xff]   ;;  %v2806_v23 = vld [vmem:[#allocation4 + $0xe8] sm:$0xff]  }
  0x33   :  { %2471 = vmatmul.mubr.msk.bf16.gmra.mrb[4].mxu0 %vm88_vm0, %v68_v16  ;;  %v2799_v16 = vld [vmem:[#allocation4 + $0xb0] sm:$0xff]  }
  0x34   :  { %2474 = vmatprep.mubr.msk.bf16.mxu0 %vm88_vm0, %v69_v17  ;;  %2487 = vmatpush3.bf16.msra.mxu1 %v2787_v18  ;;  %v2800_v17 = vld [vmem:[#allocation4 + $0xb8] sm:$0xff]   ;;  %v2801_v18 = vld [vmem:[#allocation4 + $0xc0] sm:$0xff]  }
  0x35   :  { %2488 = vmatprep.subr.bf16.mxu1 %v2788_v21  ;;  %2517 = vmatpush3.bf16.msra.mxu0 %v2794_v34 }
  0x36   :  { %2518 = vmatprep.subr.bf16.mxu0 %v2795_v35 }
  0x38   :  { %2489 = vmatpush3.bf16.msra.mxu1 %v2788_v21  ;;  %v2804_v21 = vld [vmem:[#allocation4 + $0xd8] sm:$0xff]  }
  0x39   :  { %2490 = vmatprep.subr.bf16.mxu1 %v2789_v24  ;;  %2519 = vmatpush3.bf16.msra.mxu0 %v2795_v35 }
  0x3a   :  { %2520 = vmatprep.subr.bf16.mxu0 %v2796_v36 }
  0x3b   :  { %2475 = vmatmul.mubr.msk.bf16.gmra.mrb[8].mxu0 %vm88_vm0, %v70_v25 }
  0x3c   :  { %2478 = vmatprep.mubr.msk.bf16.mxu0 %vm88_vm0, %v71_v26  ;;  %2491 = vmatpush3.bf16.msra.mxu1 %v2789_v24  ;;  %v2200_v24 = vld [vmem:[%s3556_s4 + $0x1] ss:$0 sm:$0xff] }
  0x3d   :  { %2492 = vmatprep.subr.bf16.mxu1 %v2790_v29  ;;  %2521 = vmatpush3.bf16.msra.mxu0 %v2796_v36 }
  0x3e   :  { %2522 = vmatprep.subr.bf16.mxu0 %v2797_v37 }
  0x40   :  { %2493 = vmatpush3.bf16.msra.mxu1 %v2790_v29 }
  0x41   :  { %2494 = vmatprep.subr.bf16.mxu1 %v2791_v31  ;;  %2523 = vmatpush3.bf16.msra.mxu0 %v2797_v37 }
  0x42   :  { %2524 = vmatprep.subr.bf16.mxu0 %v2798_v38 }
  0x43   :  { %2479 = vmatmul.mubr.msk.bf16.gmra.mrb[12].mxu0 %vm88_vm0, %v72_v30 }
  0x44   :  { %2495 = vmatpush3.bf16.msra.mxu1 %v2791_v31 }
  0x45   :  { %2496 = vmatprep.subr.bf16.mxu1 %v2792_v32  ;;  %2525 = vmatpush3.bf16.msra.mxu0 %v2798_v38 }
  0x46   :  { %2526 = vmatprep.subr.bf16.mxu0 %v2799_v16 }
  0x48   :  { %2497 = vmatpush3.bf16.msra.mxu1 %v2792_v32 }
  0x49   :  { %2527 = vmatpush3.bf16.msra.mxu0 %v2799_v16  ;;  %2546 = vmatprep.subr.bf16.mxu1 %v2801_v18 }
  0x4a   :  { %2528 = vmatprep.subr.bf16.mxu0 %v2800_v17 }
  0x4d   :  { %2529 = vmatpush3.bf16.msra.mxu0 %v2800_v17  ;;  %v2807_v17 = vld [vmem:[#allocation4 + $0xf0] sm:$0xff]  }
  0xfe   :  { %v2468_v40 = vpop.f32.mrb[0].mxu0 }
  0xff   :  { %v156_v41 = vadd.f32 %v2468_v40, %v2189_v39  ;;  %v147_v42 = vpop.f32.mrb[1].mxu0 }
 0x100   :  { %v148_v43 = vadd.f32 %v2189_v39, %v147_v42  ;;  %v2469_v44 = vpop.f32.mrb[2].mxu0 }
 0x101   :  { %212 = vst [vmem:[%s3557_s5 + $0x10] sm:$0xff] %v156_v41  ;;  %v159_v45 = vadd.f32 %v2469_v44, %v2189_v39  ;;  %v150_v46 = vpop.f32.mrb[3].mxu0 }
 0x102   :  { %210 = vst [vmem:[%s3557_s5] sm:$0xff] %v148_v43  ;;  %v151_v47 = vadd.f32 %v2189_v39, %v150_v46 }
 0x103   :  { %213 = vst [vmem:[%s3557_s5 + $0x18] sm:$0xff] %v159_v45  ;;  %v227_v48 = vpack.c.bf16 %v159_v45, %v156_v41 }
 0x104   :  { %211 = vst [vmem:[%s3557_s5 + $0x8] sm:$0xff] %v151_v47  ;;  %v226_v49 = vpack.c.bf16 %v151_v47, %v148_v43 }
 0x106   :  { %v2472_v50 = vpop.f32.mrb[4].mxu0  ;;  %2498 = vmatprep.mubr.bf16.mxu1 %v226_v49 }
 0x107   :  { %v172_v51 = vadd.f32 %v2472_v50, %v2189_v39  ;;  %v163_v52 = vpop.f32.mrb[5].mxu0  ;;  %2499 = vmatmul.mubr.bf16.vlgmr.msra.gmra.mrb[0].mxu1 %v227_v48 }
 0x108   :  { %v164_v53 = vadd.f32 %v2189_v39, %v163_v52  ;;  %v2473_v54 = vpop.f32.mrb[6].mxu0  ;;  %2547 = vmatpush3.bf16.msra.mxu1 %v2801_v18  ;;  %v2808_v18 = vld [vmem:[#allocation4 + $0xf8] sm:$0xff]  }
 0x109   :  { %216 = vst [vmem:[%s3557_s5 + $0x30] sm:$0xff] %v172_v51  ;;  %v175_v55 = vadd.f32 %v2473_v54, %v2189_v39  ;;  %v166_v56 = vpop.f32.mrb[7].mxu0  ;;  %2548 = vmatprep.subr.bf16.mxu1 %v2802_v19 }
 0x10a   :  { %214 = vst [vmem:[%s3557_s5 + $0x20] sm:$0xff] %v164_v53  ;;  %v167_v57 = vadd.f32 %v2189_v39, %v166_v56 }
 0x10b   :  { %217 = vst [vmem:[%s3557_s5 + $0x38] sm:$0xff] %v175_v55  ;;  %v229_v58 = vpack.c.bf16 %v175_v55, %v172_v51 }
 0x10c   :  { %215 = vst [vmem:[%s3557_s5 + $0x28] sm:$0xff] %v167_v57  ;;  %v228_v59 = vpack.c.bf16 %v167_v57, %v164_v53  ;;  %2549 = vmatpush3.bf16.msra.mxu1 %v2802_v19  ;;  %v2809_v19 = vld [vmem:[#allocation4 + $0x100] sm:$0xff]  }
 0x10d   :  { %2550 = vmatprep.subr.bf16.mxu1 %v2803_v20  ;;  %2578 = vmatprep.subr.bf16.mxu0 %v2809_v19 }
 0x10e   :  { %v2476_v60 = vpop.f32.mrb[8].mxu0  ;;  %2502 = vmatprep.mubr.bf16.mxu1 %v228_v59 }
 0x10f   :  { %v188_v61 = vadd.f32 %v2476_v60, %v2189_v39  ;;  %v179_v62 = vpop.f32.mrb[9].mxu0  ;;  %2503 = vmatmul.mubr.bf16.gmra.mrb[4].mxu1 %v229_v58 }
 0x110   :  { %v180_v63 = vadd.f32 %v2189_v39, %v179_v62  ;;  %v2477_v0 = vpop.f32.mrb[10].mxu0  ;;  %2551 = vmatpush3.bf16.msra.mxu1 %v2803_v20  ;;  %v2810_v20 = vld [vmem:[#allocation4 + $0x108] sm:$0xff]  }
 0x111   :  { %220 = vst [vmem:[%s3557_s5 + $0x50] sm:$0xff] %v188_v61  ;;  %v191_v1 = vadd.f32 %v2477_v0, %v2189_v39  ;;  %v182_v2 = vpop.f32.mrb[11].mxu0  ;;  %2552 = vmatprep.subr.bf16.mxu1 %v2804_v21 }
 0x112   :  { %218 = vst [vmem:[%s3557_s5 + $0x40] sm:$0xff] %v180_v63  ;;  %v183_v3 = vadd.f32 %v2189_v39, %v182_v2 }
 0x113   :  { %221 = vst [vmem:[%s3557_s5 + $0x58] sm:$0xff] %v191_v1  ;;  %v231_v4 = vpack.c.bf16 %v191_v1, %v188_v61 }
 0x114   :  { %219 = vst [vmem:[%s3557_s5 + $0x48] sm:$0xff] %v183_v3  ;;  %v230_v5 = vpack.c.bf16 %v183_v3, %v180_v63  ;;  %2553 = vmatpush3.bf16.msra.mxu1 %v2804_v21  ;;  %v2811_v21 = vld [vmem:[#allocation4 + $0x110] sm:$0xff]  }
 0x115   :  { %2554 = vmatprep.subr.bf16.mxu1 %v2805_v22 }
 0x116   :  { %v2480_v6 = vpop.f32.mrb[12].mxu0  ;;  %2506 = vmatprep.mubr.bf16.mxu1 %v230_v5 }
 0x117   :  { %v204_v7 = vadd.f32 %v2480_v6, %v2189_v39  ;;  %v195_v8 = vpop.f32.mrb[13].mxu0  ;;  %2507 = vmatmul.mubr.bf16.gmra.mrb[8].mxu1 %v231_v4 }
 0x118   :  { %v196_v9 = vadd.f32 %v2189_v39, %v195_v8  ;;  %v2481_v10 = vpop.f32.mrb[14].mxu0  ;;  %2555 = vmatpush3.bf16.msra.mxu1 %v2805_v22  ;;  %v2812_v22 = vld [vmem:[#allocation4 + $0x118] sm:$0xff]  }
 0x119   :  { %224 = vst [vmem:[%s3557_s5 + $0x70] sm:$0xff] %v204_v7  ;;  %v207_v11 = vadd.f32 %v2481_v10, %v2189_v39  ;;  %v198_v12 = vpop.f32.mrb[15].mxu0  ;;  %2556 = vmatprep.subr.bf16.mxu1 %v2806_v23 }
 0x11a   :  { %222 = vst [vmem:[%s3557_s5 + $0x60] sm:$0xff] %v196_v9  ;;  %v199_v13 = vadd.f32 %v2189_v39, %v198_v12 }
 0x11b   :  { %225 = vst [vmem:[%s3557_s5 + $0x78] sm:$0xff] %v207_v11  ;;  %v233_v14 = vpack.c.bf16 %v207_v11, %v204_v7 }
 0x11c   :  { %223 = vst [vmem:[%s3557_s5 + $0x68] sm:$0xff] %v199_v13  ;;  %v232_v15 = vpack.c.bf16 %v199_v13, %v196_v9  ;;  %2557 = vmatpush3.bf16.msra.mxu1 %v2806_v23  ;;  %v2813_v23 = vld [vmem:[#allocation4 + $0x120] sm:$0xff]  }
 0x11d   :  { %2558 = vmatprep.subr.bf16.mxu1 %v2807_v17 }
 0x11e   :  { %2510 = vmatprep.mubr.bf16.mxu1 %v232_v15 }
 0x11f   :  { %2511 = vmatmul.mubr.bf16.gmra.mrb[12].mxu1 %v233_v14 }
 0x120   :  { %2559 = vmatpush3.bf16.msra.mxu1 %v2807_v17 }
 0x121   :  { %2560 = vmatprep.subr.bf16.mxu1 %v2808_v18 }
 0x124   :  { %2561 = vmatpush3.bf16.msra.mxu1 %v2808_v18  ;;  %v2815_v18 = vld [vmem:[#allocation4 + $0x130] sm:$0xff]  }
 0x1da   :  { %v2500_v25 = vpop.f32.mrb[0].mxu1 }
 0x1db   :  { %v350_v26 = vadd.f32 %v2500_v25, %v2200_v24  ;;  %v341_v27 = vpop.f32.mrb[1].mxu1  ;;  %v2210_v25 = vld [vmem:[%s3556_s4 + $0x2] ss:$0 sm:$0xff] }
 0x1dc   :  { %v342_v28 = vadd.f32 %v2200_v24, %v341_v27  ;;  %v2501_v29 = vpop.f32.mrb[2].mxu1 }
 0x1dd   :  { %v353_v30 = vadd.f32 %v2501_v29, %v2200_v24  ;;  %v344_v31 = vpop.f32.mrb[3].mxu1  ;;  %v406_v33 = vmax.f32 %v350_v26, 0.0 }
 0x1de   :  { %v345_v32 = vadd.f32 %v2200_v24, %v344_v31  ;;  %v404_v35 = vmax.f32 %v342_v28, 0.0 }
 0x1df   :  { %v407_v34 = vmax.f32 %v353_v30, 0.0 }
 0x1e0   :  { %v405_v36 = vmax.f32 %v345_v32, 0.0 }
 0x1e1   :  { %v421_v37 = vpack.c.bf16 %v407_v34, %v406_v33 }
 0x1e2   :  { %v420_v38 = vpack.c.bf16 %v405_v36, %v404_v35  ;;  %v2504_v39 = vpop.f32.mrb[4].mxu1 }
 0x1e3   :  { %v366_v40 = vadd.f32 %v2504_v39, %v2200_v24  ;;  %v357_v41 = vpop.f32.mrb[5].mxu1 }
 0x1e4   :  { %v358_v42 = vadd.f32 %v2200_v24, %v357_v41  ;;  %v2505_v43 = vpop.f32.mrb[6].mxu1  ;;  %2530 = vmatprep.mubr.bf16.mxu0 %v420_v38 }
 0x1e5   :  { %v369_v44 = vadd.f32 %v2505_v43, %v2200_v24  ;;  %v360_v45 = vpop.f32.mrb[7].mxu1  ;;  %2531 = vmatmul.mubr.bf16.vlgmr.msra.gmra.mrb[16].mxu0 %v421_v37  ;;  %v410_v47 = vmax.f32 %v366_v40, 0.0 }
 0x1e6   :  { %v361_v46 = vadd.f32 %v2200_v24, %v360_v45  ;;  %v408_v49 = vmax.f32 %v358_v42, 0.0  ;;  %2579 = vmatpush3.bf16.msra.mxu0 %v2809_v19  ;;  %v2816_v19 = vld [vmem:[#allocation4 + $0x138] sm:$0xff]  }
 0x1e7   :  { %v411_v48 = vmax.f32 %v369_v44, 0.0  ;;  %2580 = vmatprep.subr.bf16.mxu0 %v2810_v20 }
 0x1e8   :  { %v409_v50 = vmax.f32 %v361_v46, 0.0 }
 0x1e9   :  { %v423_v51 = vpack.c.bf16 %v411_v48, %v410_v47 }
 0x1ea   :  { %v422_v52 = vpack.c.bf16 %v409_v50, %v408_v49  ;;  %v2508_v53 = vpop.f32.mrb[8].mxu1  ;;  %2581 = vmatpush3.bf16.msra.mxu0 %v2810_v20  ;;  %v2220_v20 = vld [vmem:[%s3556_s4 + $0x3] ss:$0 sm:$0xff] }
 0x1eb   :  { %v382_v54 = vadd.f32 %v2508_v53, %v2200_v24  ;;  %v373_v55 = vpop.f32.mrb[9].mxu1  ;;  %2582 = vmatprep.subr.bf16.mxu0 %v2811_v21 }
 0x1ec   :  { %v374_v56 = vadd.f32 %v2200_v24, %v373_v55  ;;  %v2509_v57 = vpop.f32.mrb[10].mxu1  ;;  %2534 = vmatprep.mubr.bf16.mxu0 %v422_v52 }
 0x1ed   :  { %v385_v58 = vadd.f32 %v2509_v57, %v2200_v24  ;;  %v376_v59 = vpop.f32.mrb[11].mxu1  ;;  %2535 = vmatmul.mubr.bf16.gmra.mrb[20].mxu0 %v423_v51  ;;  %v414_v61 = vmax.f32 %v382_v54, 0.0 }
 0x1ee   :  { %v377_v60 = vadd.f32 %v2200_v24, %v376_v59  ;;  %v412_v63 = vmax.f32 %v374_v56, 0.0  ;;  %2583 = vmatpush3.bf16.msra.mxu0 %v2811_v21 }
 0x1ef   :  { %v415_v62 = vmax.f32 %v385_v58, 0.0  ;;  %2584 = vmatprep.subr.bf16.mxu0 %v2812_v22 }
 0x1f0   :  { %v413_v0 = vmax.f32 %v377_v60, 0.0 }
 0x1f1   :  { %v425_v1 = vpack.c.bf16 %v415_v62, %v414_v61 }
 0x1f2   :  { %v424_v2 = vpack.c.bf16 %v413_v0, %v412_v63  ;;  %v2512_v3 = vpop.f32.mrb[12].mxu1  ;;  %2585 = vmatpush3.bf16.msra.mxu0 %v2812_v22 }
 0x1f3   :  { %v398_v4 = vadd.f32 %v2512_v3, %v2200_v24  ;;  %v389_v5 = vpop.f32.mrb[13].mxu1  ;;  %2586 = vmatprep.subr.bf16.mxu0 %v2813_v23 }
 0x1f4   :  { %v390_v6 = vadd.f32 %v2200_v24, %v389_v5  ;;  %v2513_v7 = vpop.f32.mrb[14].mxu1  ;;  %2538 = vmatprep.mubr.bf16.mxu0 %v424_v2 }
 0x1f5   :  { %v401_v8 = vadd.f32 %v2513_v7, %v2200_v24  ;;  %v392_v9 = vpop.f32.mrb[15].mxu1  ;;  %2539 = vmatmul.mubr.bf16.gmra.mrb[24].mxu0 %v425_v1  ;;  %v418_v11 = vmax.f32 %v398_v4, 0.0 }
 0x1f6   :  { %v393_v10 = vadd.f32 %v2200_v24, %v392_v9  ;;  %v416_v13 = vmax.f32 %v390_v6, 0.0  ;;  %v2814_v24 = vld [vmem:[#allocation4 + $0x128] sm:$0xff]   ;;  %2587 = vmatpush3.bf16.msra.mxu0 %v2813_v23 }
 0x1f7   :  { %v419_v12 = vmax.f32 %v401_v8, 0.0  ;;  %2588 = vmatprep.subr.bf16.mxu0 %v2814_v24 }
 0x1f8   :  { %v417_v14 = vmax.f32 %v393_v10, 0.0 }
 0x1f9   :  { %v427_v15 = vpack.c.bf16 %v419_v12, %v418_v11 }
 0x1fa   :  { %v426_v16 = vpack.c.bf16 %v417_v14, %v416_v13  ;;  %2589 = vmatpush3.bf16.msra.mxu0 %v2814_v24 }
 0x1fb   :  { %2590 = vmatprep.subr.bf16.mxu0 %v2815_v18 }
 0x1fc   :  { %2542 = vmatprep.mubr.bf16.mxu0 %v426_v16 }
 0x1fd   :  { %2543 = vmatmul.mubr.bf16.gmra.mrb[28].mxu0 %v427_v15 }
 0x1fe   :  { %2591 = vmatpush3.bf16.msra.mxu0 %v2815_v18 }
 0x1ff   :  { %2592 = vmatprep.subr.bf16.mxu0 %v2816_v19 }
 0x202   :  { %2593 = vmatpush3.bf16.msra.mxu0 %v2816_v19 }
 0x2b8   :  { %v2532_v26 = vpop.f32.mrb[16].mxu0 }
 0x2b9   :  { %v544_v27 = vadd.f32 %v2532_v26, %v2210_v25  ;;  %v535_v28 = vpop.f32.mrb[17].mxu0 }
 0x2ba   :  { %v536_v29 = vadd.f32 %v2210_v25, %v535_v28  ;;  %v2533_v30 = vpop.f32.mrb[18].mxu0 }
 0x2bb   :  { %v547_v31 = vadd.f32 %v2533_v30, %v2210_v25  ;;  %v538_v32 = vpop.f32.mrb[19].mxu0  ;;  %v600_v34 = vmax.f32 %v544_v27, 0.0 }
 0x2bc   :  { %v539_v33 = vadd.f32 %v2210_v25, %v538_v32  ;;  %v598_v36 = vmax.f32 %v536_v29, 0.0 }
 0x2bd   :  { %v601_v35 = vmax.f32 %v547_v31, 0.0 }
 0x2be   :  { %v599_v37 = vmax.f32 %v539_v33, 0.0 }
 0x2bf   :  { %v615_v38 = vpack.c.bf16 %v601_v35, %v600_v34 }
 0x2c0   :  { %v614_v39 = vpack.c.bf16 %v599_v37, %v598_v36  ;;  %v2536_v40 = vpop.f32.mrb[20].mxu0 }
 0x2c1   :  { %v560_v41 = vadd.f32 %v2536_v40, %v2210_v25  ;;  %v551_v42 = vpop.f32.mrb[21].mxu0 }
 0x2c2   :  { %v552_v43 = vadd.f32 %v2210_v25, %v551_v42  ;;  %v2537_v44 = vpop.f32.mrb[22].mxu0  ;;  %2562 = vmatprep.mubr.bf16.mxu1 %v614_v39 }
 0x2c3   :  { %v563_v45 = vadd.f32 %v2537_v44, %v2210_v25  ;;  %v554_v46 = vpop.f32.mrb[23].mxu0  ;;  %2563 = vmatmul.mubr.bf16.vlgmr.msra.gmra.mrb[16].mxu1 %v615_v38  ;;  %v604_v48 = vmax.f32 %v560_v41, 0.0 }
 0x2c4   :  { %v555_v47 = vadd.f32 %v2210_v25, %v554_v46  ;;  %v602_v50 = vmax.f32 %v552_v43, 0.0 }
 0x2c5   :  { %v605_v49 = vmax.f32 %v563_v45, 0.0 }
 0x2c6   :  { %v603_v51 = vmax.f32 %v555_v47, 0.0 }
 0x2c7   :  { %v617_v52 = vpack.c.bf16 %v605_v49, %v604_v48 }
 0x2c8   :  { %v616_v53 = vpack.c.bf16 %v603_v51, %v602_v50  ;;  %v2540_v54 = vpop.f32.mrb[24].mxu0 }
 0x2c9   :  { %v576_v55 = vadd.f32 %v2540_v54, %v2210_v25  ;;  %v567_v56 = vpop.f32.mrb[25].mxu0 }
 0x2ca   :  { %v568_v57 = vadd.f32 %v2210_v25, %v567_v56  ;;  %v2541_v58 = vpop.f32.mrb[26].mxu0  ;;  %2566 = vmatprep.mubr.bf16.mxu1 %v616_v53 }
 0x2cb   :  { %v579_v59 = vadd.f32 %v2541_v58, %v2210_v25  ;;  %v570_v60 = vpop.f32.mrb[27].mxu0  ;;  %2567 = vmatmul.mubr.bf16.gmra.mrb[20].mxu1 %v617_v52  ;;  %v608_v62 = vmax.f32 %v576_v55, 0.0 }
 0x2cc   :  { %v571_v61 = vadd.f32 %v2210_v25, %v570_v60  ;;  %v606_v0 = vmax.f32 %v568_v57, 0.0 }
 0x2cd   :  { %v609_v63 = vmax.f32 %v579_v59, 0.0 }
 0x2ce   :  { %v607_v1 = vmax.f32 %v571_v61, 0.0 }
 0x2cf   :  { %v619_v2 = vpack.c.bf16 %v609_v63, %v608_v62 }
 0x2d0   :  { %v618_v3 = vpack.c.bf16 %v607_v1, %v606_v0  ;;  %v2544_v4 = vpop.f32.mrb[28].mxu0 }
 0x2d1   :  { %v592_v5 = vadd.f32 %v2544_v4, %v2210_v25  ;;  %v583_v6 = vpop.f32.mrb[29].mxu0 }
 0x2d2   :  { %v584_v7 = vadd.f32 %v2210_v25, %v583_v6  ;;  %v2545_v8 = vpop.f32.mrb[30].mxu0  ;;  %2570 = vmatprep.mubr.bf16.mxu1 %v618_v3 }
 0x2d3   :  { %v595_v9 = vadd.f32 %v2545_v8, %v2210_v25  ;;  %v586_v10 = vpop.f32.mrb[31].mxu0  ;;  %2571 = vmatmul.mubr.bf16.gmra.mrb[24].mxu1 %v619_v2  ;;  %v612_v12 = vmax.f32 %v592_v5, 0.0 }
 0x2d4   :  { %v587_v11 = vadd.f32 %v2210_v25, %v586_v10  ;;  %v610_v14 = vmax.f32 %v584_v7, 0.0 }
 0x2d5   :  { %v613_v13 = vmax.f32 %v595_v9, 0.0 }
 0x2d6   :  { %v611_v15 = vmax.f32 %v587_v11, 0.0 }
 0x2d7   :  { %v621_v16 = vpack.c.bf16 %v613_v13, %v612_v12  ;;  %v986_v13 = vlaneseq }
 0x2d8   :  { %v620_v17 = vpack.c.bf16 %v611_v15, %v610_v14  ;;  %v3110_v14 = vld [vmem:[%s3556_s4 + $0x4] ss:$0 sm:$0xff] }
 0x2d9   :  { %v3112_v15 = vand.u32 127, %v986_v13 }
 0x2da   :  { %2574 = vmatprep.mubr.bf16.mxu1 %v620_v17 }
 0x2db   :  { %2575 = vmatmul.mubr.bf16.gmra.mrb[28].mxu1 %v621_v16  ;;  %vm988_vm1 = vcmp.lt.s32.totalorder %v3112_v15, 64  ;;  %v2837_v15 = vld [vmem:[#allocation4 + $0x1e0] sm:$0xff]  }
 0x396   :  { %v2564_v21 = vpop.f32.mrb[16].mxu1 }
 0x397   :  { %v738_v22 = vadd.f32 %v2564_v21, %v2220_v20  ;;  %v729_v23 = vpop.f32.mrb[17].mxu1 }
 0x398   :  { %v730_v24 = vadd.f32 %v2220_v20, %v729_v23  ;;  %v2565_v25 = vpop.f32.mrb[18].mxu1 }
 0x399   :  { %v741_v26 = vadd.f32 %v2565_v25, %v2220_v20  ;;  %v732_v27 = vpop.f32.mrb[19].mxu1  ;;  %v794_v29 = vmax.f32 %v738_v22, 0.0 }
 0x39a   :  { %v733_v28 = vadd.f32 %v2220_v20, %v732_v27  ;;  %v792_v31 = vmax.f32 %v730_v24, 0.0 }
 0x39b   :  { %v795_v30 = vmax.f32 %v741_v26, 0.0 }
 0x39c   :  { %v793_v32 = vmax.f32 %v733_v28, 0.0 }
 0x39d   :  { %v809_v33 = vpack.c.bf16 %v795_v30, %v794_v29 }
 0x39e   :  { %v808_v34 = vpack.c.bf16 %v793_v32, %v792_v31  ;;  %v2568_v35 = vpop.f32.mrb[20].mxu1 }
 0x39f   :  { %v754_v36 = vadd.f32 %v2568_v35, %v2220_v20  ;;  %v745_v37 = vpop.f32.mrb[21].mxu1 }
 0x3a0   :  { %v746_v38 = vadd.f32 %v2220_v20, %v745_v37  ;;  %v2569_v39 = vpop.f32.mrb[22].mxu1  ;;  %2594 = vmatprep.mubr.bf16.mxu0 %v808_v34 }
 0x3a1   :  { %v757_v40 = vadd.f32 %v2569_v39, %v2220_v20  ;;  %v748_v41 = vpop.f32.mrb[23].mxu1  ;;  %2595 = vmatmul.mubr.bf16.vlgmr.msra.gmra.mrb[32].mxu0 %v809_v33  ;;  %v798_v43 = vmax.f32 %v754_v36, 0.0 }
 0x3a2   :  { %v749_v42 = vadd.f32 %v2220_v20, %v748_v41  ;;  %v796_v45 = vmax.f32 %v746_v38, 0.0 }
 0x3a3   :  { %v799_v44 = vmax.f32 %v757_v40, 0.0 }
 0x3a4   :  { %v797_v46 = vmax.f32 %v749_v42, 0.0 }
 0x3a5   :  { %v811_v47 = vpack.c.bf16 %v799_v44, %v798_v43 }
 0x3a6   :  { %v810_v48 = vpack.c.bf16 %v797_v46, %v796_v45  ;;  %v2572_v49 = vpop.f32.mrb[24].mxu1 }
 0x3a7   :  { %v770_v50 = vadd.f32 %v2572_v49, %v2220_v20  ;;  %v761_v51 = vpop.f32.mrb[25].mxu1 }
 0x3a8   :  { %v762_v52 = vadd.f32 %v2220_v20, %v761_v51  ;;  %v2573_v53 = vpop.f32.mrb[26].mxu1  ;;  %2598 = vmatprep.mubr.bf16.mxu0 %v810_v48 }
 0x3a9   :  { %v773_v54 = vadd.f32 %v2573_v53, %v2220_v20  ;;  %v764_v55 = vpop.f32.mrb[27].mxu1  ;;  %2599 = vmatmul.mubr.bf16.gmra.mrb[36].mxu0 %v811_v47  ;;  %v802_v57 = vmax.f32 %v770_v50, 0.0 }
 0x3aa   :  { %v765_v56 = vadd.f32 %v2220_v20, %v764_v55  ;;  %v800_v59 = vmax.f32 %v762_v52, 0.0 }
 0x3ab   :  { %v803_v58 = vmax.f32 %v773_v54, 0.0 }
 0x3ac   :  { %v801_v60 = vmax.f32 %v765_v56, 0.0 }
 0x3ad   :  { %v813_v61 = vpack.c.bf16 %v803_v58, %v802_v57 }
 0x3ae   :  { %v812_v62 = vpack.c.bf16 %v801_v60, %v800_v59  ;;  %v2576_v63 = vpop.f32.mrb[28].mxu1 }
 0x3af   :  { %v786_v0 = vadd.f32 %v2576_v63, %v2220_v20  ;;  %v777_v1 = vpop.f32.mrb[29].mxu1 }
 0x3b0   :  { %v778_v2 = vadd.f32 %v2220_v20, %v777_v1  ;;  %v2577_v3 = vpop.f32.mrb[30].mxu1  ;;  %2602 = vmatprep.mubr.bf16.mxu0 %v812_v62 }
 0x3b1   :  { %v789_v4 = vadd.f32 %v2577_v3, %v2220_v20  ;;  %v780_v5 = vpop.f32.mrb[31].mxu1  ;;  %2603 = vmatmul.mubr.bf16.gmra.mrb[40].mxu0 %v813_v61  ;;  %v806_v7 = vmax.f32 %v786_v0, 0.0 }
 0x3b2   :  { %v781_v6 = vadd.f32 %v2220_v20, %v780_v5  ;;  %v804_v9 = vmax.f32 %v778_v2, 0.0 }
 0x3b3   :  { %v807_v8 = vmax.f32 %v789_v4, 0.0 }
 0x3b4   :  { %v805_v10 = vmax.f32 %v781_v6, 0.0 }
 0x3b5   :  { %v815_v11 = vpack.c.bf16 %v807_v8, %v806_v7 }
 0x3b6   :  { %v814_v12 = vpack.c.bf16 %v805_v10, %v804_v9 }
 0x3b8   :  { %2606 = vmatprep.mubr.bf16.mxu0 %v814_v12 }
 0x3b9   :  { %2607 = vmatmul.mubr.bf16.gmra.mrb[44].mxu0 %v815_v11 }
 0x474   :  { %v2596_v16 = vpop.f32.mrb[32].mxu0 }
 0x475   :  { %v932_v17 = vadd.f32 %v2596_v16, %v3110_v14  ;;  %v923_v18 = vpop.f32.mrb[33].mxu0 }
 0x476   :  { %v924_v19 = vadd.f32 %v3110_v14, %v923_v18  ;;  %v2597_v20 = vpop.f32.mrb[34].mxu0  ;;  %v2818_v18 = vld [vmem:[#allocation4 + $0x148] sm:$0xff]  }
 0x477   :  { %v2241_v21 = vclamps-f32 %v932_v17, 10.0  ;;  %v935_v22 = vadd.f32 %v2597_v20, %v3110_v14  ;;  %v926_v23 = vpop.f32.mrb[35].mxu0  ;;  %v2820_v20 = vld [vmem:[#allocation4 + $0x158] sm:$0xff]  }
 0x478   :  { %v2239_v24 = vclamps-f32 %v924_v19, 10.0  ;;  %v927_v25 = vadd.f32 %v3110_v14, %v926_v23  ;;  %v2823_v23 = vld [vmem:[#allocation4 + $0x170] sm:$0xff]  }
 0x479   :  { %v2242_v26 = vclamps-f32 %v935_v22, 10.0  ;;  %v3121_v27 = vsel %vm988_vm1, %v932_v17, %v2241_v21  ;;  %v2817_v17 = vld [vmem:[#allocation4 + $0x140] sm:$0xff]  }
 0x47a   :  { %v2240_v28 = vclamps-f32 %v927_v25, 10.0  ;;  %1058 = vrot.lane.b32.xlu1 %v3121_v27, %s2933_s2  ;;  %2257 = vst [vmem:[%s3557_s5 + $0x90] sm:$0xff] %v3121_v27  ;;  %v3131_v29 = vsel %vm988_vm1, %v924_v19, %v2239_v24  ;;  %2610 = vmatprep.subr.bf16.mxu1 %v2817_v17  ;;  %v2819_v19 = vld [vmem:[#allocation4 + $0x150] sm:$0xff]   ;;  %v2821_v21 = vld [vmem:[#allocation4 + $0x160] sm:$0xff]  }
 0x47b   :  { %1054 = vrot.lane.b32.xlu0 %v3131_v29, %s2933_s2  ;;  %2255 = vst [vmem:[%s3557_s5 + $0x80] sm:$0xff] %v3131_v29  ;;  %v3141_v30 = vsel %vm988_vm1, %v935_v22, %v2242_v26  ;;  %2611 = vmatpush3.bf16.msra.mxu1 %v2817_v17  ;;  %v2822_v22 = vld [vmem:[#allocation4 + $0x168] sm:$0xff]   ;;  %v1318_v17 = vld [vmem:[#allocation2 + $0x40] sm:$0xff] }
 0x47c   :  { %v2600_v31 = vpop.f32.mrb[36].mxu0  ;;  %2258 = vst [vmem:[%s3557_s5 + $0x98] sm:$0xff] %v3141_v30  ;;  %v3149_v32 = vsel %vm988_vm1, %v927_v25, %v2240_v28  ;;  %2612 = vmatprep.subr.bf16.mxu1 %v2818_v18 }
 0x47d   :  { %v948_v33 = vadd.f32 %v2600_v31, %v3110_v14  ;;  %v939_v34 = vpop.f32.mrb[37].mxu0  ;;  %2256 = vst [vmem:[%s3557_s5 + $0x88] sm:$0xff] %v3149_v32 }
 0x47e   :  { %v940_v35 = vadd.f32 %v3110_v14, %v939_v34  ;;  %1060 = vrot.lane.b32.xlu1 %v3141_v30, %s2933_s2  ;;  %v2601_v36 = vpop.f32.mrb[38].mxu0 }
 0x47f   :  { %v2245_v37 = vclamps-f32 %v948_v33, 10.0  ;;  %v951_v38 = vadd.f32 %v2601_v36, %v3110_v14  ;;  %v942_v39 = vpop.f32.mrb[39].mxu0  ;;  %1056 = vrot.lane.b32.xlu0 %v3149_v32, %s2933_s2  ;;  %2613 = vmatpush3.bf16.msra.mxu1 %v2818_v18 }
 0x480   :  { %v2243_v40 = vclamps-f32 %v940_v35, 10.0  ;;  %v943_v41 = vadd.f32 %v3110_v14, %v942_v39  ;;  %2614 = vmatprep.subr.bf16.mxu1 %v2819_v19 }
 0x481   :  { %v2246_v42 = vclamps-f32 %v951_v38, 10.0  ;;  %v3165_v43 = vsel %vm988_vm1, %v948_v33, %v2245_v37 }
 0x482   :  { %v2244_v44 = vclamps-f32 %v943_v41, 10.0  ;;  %v3169_v45 = vsel %vm988_vm1, %v940_v35, %v2243_v40  ;;  %2261 = vst [vmem:[%s3557_s5 + $0xb0] sm:$0xff] %v3165_v43 }
 0x483   :  { %2259 = vst [vmem:[%s3557_s5 + $0xa0] sm:$0xff] %v3169_v45  ;;  %1062 = vrot.lane.b32.xlu0 %v3169_v45, %s2933_s2  ;;  %v3183_v46 = vsel %vm988_vm1, %v951_v38, %v2246_v42  ;;  %2615 = vmatpush3.bf16.msra.mxu1 %v2819_v19 }
 0x484   :  { %v2604_v47 = vpop.f32.mrb[40].mxu0  ;;  %v3187_v48 = vsel %vm988_vm1, %v943_v41, %v2244_v44  ;;  %2262 = vst [vmem:[%s3557_s5 + $0xb8] sm:$0xff] %v3183_v46  ;;  %2616 = vmatprep.subr.bf16.mxu1 %v2820_v20 }
 0x485   :  { %v964_v49 = vadd.f32 %v2604_v47, %v3110_v14  ;;  %v955_v50 = vpop.f32.mrb[41].mxu0  ;;  %1064 = vrot.lane.b32.xlu1 %v3187_v48, %s2933_s2  ;;  %2260 = vst [vmem:[%s3557_s5 + $0xa8] sm:$0xff] %v3187_v48 }
 0x486   :  { %v956_v51 = vadd.f32 %v3110_v14, %v955_v50  ;;  %v2605_v52 = vpop.f32.mrb[42].mxu0  ;;  %v1313_v50 = vld [vmem:[#allocation2 + $0x18] sm:$0xff] }
 0x487   :  { %v2249_v53 = vclamps-f32 %v964_v49, 10.0  ;;  %v967_v54 = vadd.f32 %v2605_v52, %v3110_v14  ;;  %v958_v55 = vpop.f32.mrb[43].mxu0  ;;  %1066 = vrot.lane.b32.xlu0 %v3165_v43, %s2933_s2  ;;  %2617 = vmatpush3.bf16.msra.mxu1 %v2820_v20  ;;  %v1136_v52 = vld [vmem:[%s3553_s1 + $0x10] sm:$0xff] }
 0x488   :  { %v2247_v56 = vclamps-f32 %v956_v51, 10.0  ;;  %v959_v57 = vadd.f32 %v3110_v14, %v958_v55  ;;  %2618 = vmatprep.subr.bf16.mxu1 %v2821_v21 }
 0x489   :  { %v2250_v58 = vclamps-f32 %v967_v54, 10.0  ;;  %1068 = vrot.lane.b32.xlu1 %v3183_v46, %s2933_s2  ;;  %v3209_v59 = vsel %vm988_vm1, %v964_v49, %v2249_v53  ;;  %v1312_v49 = vld [vmem:[#allocation2 + $0x10] sm:$0xff]  ;;  %v1134_v53 = vld [vmem:[%s3553_s1] sm:$0xff] }
 0x48a   :  { %v2248_v60 = vclamps-f32 %v959_v57, 10.0  ;;  %v3213_v61 = vsel %vm988_vm1, %v956_v51, %v2247_v56  ;;  %2265 = vst [vmem:[%s3557_s5 + $0xd0] sm:$0xff] %v3209_v59  ;;  %v1310_v51 = vld [vmem:[#allocation2] sm:$0xff] }
 0x48b   :  { %2263 = vst [vmem:[%s3557_s5 + $0xc0] sm:$0xff] %v3213_v61  ;;  %1070 = vrot.lane.b32.xlu0 %v3213_v61, %s2933_s2  ;;  %v3227_v62 = vsel %vm988_vm1, %v967_v54, %v2250_v58  ;;  %2619 = vmatpush3.bf16.msra.mxu1 %v2821_v21  ;;  %v1314_v58 = vld [vmem:[#allocation2 + $0x20] sm:$0xff] }
 0x48c   :  { %v2608_v63 = vpop.f32.mrb[44].mxu0  ;;  %v3231_v0 = vsel %vm988_vm1, %v959_v57, %v2248_v60  ;;  %2266 = vst [vmem:[%s3557_s5 + $0xd8] sm:$0xff] %v3227_v62  ;;  %2620 = vmatprep.subr.bf16.mxu1 %v2822_v22  ;;  %v1311_v57 = vld [vmem:[#allocation2 + $0x8] sm:$0xff]  ;;  %v3308_v21 = vmul.f32 0.01, %v1314_v58 }
 0x48d   :  { %v980_v1 = vadd.f32 %v2608_v63, %v3110_v14  ;;  %v971_v2 = vpop.f32.mrb[45].mxu0  ;;  %2264 = vst [vmem:[%s3557_s5 + $0xc8] sm:$0xff] %v3231_v0  ;;  %1072 = vrot.lane.b32.xlu1 %v3231_v0, %s2933_s2  ;;  %v1315_v60 = vld [vmem:[#allocation2 + $0x28] sm:$0xff]  ;;  %v3306_v20 = vmul.f32 0.01, %v1311_v57 }
 0x48e   :  { %v972_v3 = vadd.f32 %v3110_v14, %v971_v2  ;;  %v2609_v4 = vpop.f32.mrb[46].mxu0 }
 0x48f   :  { %v2253_v5 = vclamps-f32 %v980_v1, 10.0  ;;  %v983_v6 = vadd.f32 %v2609_v4, %v3110_v14  ;;  %v974_v7 = vpop.f32.mrb[47].mxu0  ;;  %1074 = vrot.lane.b32.xlu0 %v3209_v59, %s2933_s2  ;;  %2621 = vmatpush3.bf16.msra.mxu1 %v2822_v22  ;;  %v3302_v4 = vmul.f32 0.01, %v1313_v50  ;;  %v3310_v22 = vmul.f32 0.01, %v1315_v60 }
 0x490   :  { %v2251_v8 = vclamps-f32 %v972_v3, 10.0  ;;  %v975_v9 = vadd.f32 %v3110_v14, %v974_v7  ;;  %2622 = vmatprep.subr.bf16.mxu1 %v2823_v23  ;;  %v1138_v50 = vld [vmem:[%s3553_s1 + $0x20] sm:$0xff] }
 0x491   :  { %v2254_v10 = vclamps-f32 %v983_v6, 10.0  ;;  %1076 = vrot.lane.b32.xlu1 %v3227_v62, %s2933_s2  ;;  %v3253_v11 = vsel %vm988_vm1, %v980_v1, %v2253_v5  ;;  %v1137_v1 = vld [vmem:[%s3553_s1 + $0x18] sm:$0xff]  ;;  %v3304_v5 = vmul.f32 0.01, %v1310_v51 }
 0x492   :  { %v2252_v12 = vclamps-f32 %v975_v9, 10.0  ;;  %v3257_v13 = vsel %vm988_vm1, %v972_v3, %v2251_v8  ;;  %2269 = vst [vmem:[%s3557_s5 + $0xf0] sm:$0xff] %v3253_v11  ;;  %v3300_v3 = vmul.f32 0.01, %v1312_v49 }
 0x493   :  { %2267 = vst [vmem:[%s3557_s5 + $0xe0] sm:$0xff] %v3257_v13  ;;  %1078 = vrot.lane.b32.xlu0 %v3257_v13, %s2933_s2  ;;  %v3271_v14 = vsel %vm988_vm1, %v983_v6, %v2254_v10  ;;  %2623 = vmatpush3.bf16.msra.mxu1 %v2823_v23  ;;  %v1316_v10 = vld [vmem:[#allocation2 + $0x30] sm:$0xff]  ;;  %v1135_v23 = vld [vmem:[%s3553_s1 + $0x8] sm:$0xff] }
 0x494   :  { %v3275_v16 = vsel %vm988_vm1, %v975_v9, %v2252_v12  ;;  %2270 = vst [vmem:[%s3557_s5 + $0xf8] sm:$0xff] %v3271_v14  ;;  %v1317_v12 = vld [vmem:[#allocation2 + $0x38] sm:$0xff] }
 0x495   :  { %2268 = vst [vmem:[%s3557_s5 + $0xe8] sm:$0xff] %v3275_v16  ;;  %1080 = vrot.lane.b32.xlu1 %v3275_v16, %s2933_s2 }
 0x497   :  { %1082 = vrot.lane.b32.xlu0 %v3253_v11, %s2933_s2 }
 0x499   :  { %1084 = vrot.lane.b32.xlu1 %v3271_v14, %s2933_s2 }
 0x4ec   :  { %v1059_v24 = vpop.permute.xlu1 %1058 }
 0x4ed   :  { %v1088_v25 = vmul.f32 0.5, %v1059_v24  ;;  %v1055_v26 = vpop.permute.xlu0 %1054 }
 0x4ee   :  { %v1086_v28 = vmul.f32 0.5, %v1055_v26 }
 0x4ef   :  { %v1106_v31 = vmul.f32 1.442695, %v1088_v25 }
 0x4f0   :  { %v1102_v33 = vmul.f32 1.442695, %v1086_v28  ;;  %v1061_v34 = vpop.permute.xlu1 %1060  ;;  %v1319_v28 = vld [vmem:[#allocation2 + $0x48] sm:$0xff] }
 0x4f1   :  { %2849 = vpow2.f32 %v1106_v31  ;;  %v1089_v35 = vmul.f32 0.5, %v1061_v34  ;;  %v1057_v36 = vpop.permute.xlu0 %1056 }
 0x4f2   :  { %2851 = vpow2.f32 %v1102_v33  ;;  %v1087_v37 = vmul.f32 0.5, %v1057_v36  ;;  %v3323_v36 = vmul.f32 0.01, %v1317_v12  ;;  %v1140_v12 = vld [vmem:[%s3553_s1 + $0x30] sm:$0xff] }
 0x4f3   :  { %v1108_v38 = vmul.f32 1.442695, %v1089_v35  ;;  %v3321_v35 = vmul.f32 0.01, %v1316_v10 }
 0x4f4   :  { %v1104_v39 = vmul.f32 1.442695, %v1087_v37  ;;  %v3325_v37 = vmul.f32 0.01, %v1318_v17 }
 0x4f5   :  { %2853 = vpow2.f32 %v1108_v38  ;;  %v1063_v40 = vpop.permute.xlu0 %1062 }
 0x4f6   :  { %2855 = vpow2.f32 %v1104_v39  ;;  %v1090_v41 = vmul.f32 0.5, %v1063_v40 }
 0x4f7   :  { %v1065_v42 = vpop.permute.xlu1 %1064 }
 0x4f8   :  { %v1110_v44 = vmul.f32 1.442695, %v1090_v41  ;;  %v1091_v47 = vmul.f32 0.5, %v1065_v42  ;;  %v1320_v42 = vld [vmem:[#allocation2 + $0x50] sm:$0xff] }
 0x4f9   :  { %v1067_v54 = vpop.permute.xlu0 %1066  ;;  %v3340_v58 = vmul.f32 0.01, %v1320_v42 }
 0x4fa   :  { %2857 = vpow2.f32 %v1110_v44  ;;  %v1112_v55 = vmul.f32 1.442695, %v1091_v47  ;;  %v1092_v56 = vmul.f32 0.5, %v1067_v54 }
 0x4fb   :  { %v2850_v63 = vpop.eup %2849  ;;  %v1069_v2 = vpop.permute.xlu1 %1068 }
 0x4fc   :  { %v2852_v6 = vpop.eup %2851  ;;  %v1152_v7 = vmul.f32 %v2850_v63, %v1136_v52  ;;  %2859 = vpow2.f32 %v1112_v55  ;;  %v1114_v8 = vmul.f32 1.442695, %v1092_v56  ;;  %v1093_v9 = vmul.f32 0.5, %v1069_v2  ;;  %v1139_v63 = vld [vmem:[%s3553_s1 + $0x28] sm:$0xff] }
 0x4fd   :  { %v1150_v18 = vmul.f32 %v2852_v6, %v1134_v53  ;;  %v1071_v19 = vpop.permute.xlu0 %1070 }
 0x4fe   :  { %2861 = vpow2.f32 %v1114_v8  ;;  %v1116_v24 = vmul.f32 1.442695, %v1093_v9  ;;  %v1094_v25 = vmul.f32 0.5, %v1071_v19  ;;  %v3316_v26 = vadd.f32 %v1152_v7, %v3121_v27 }
 0x4ff   :  { %v2854_v31 = vpop.eup %2853  ;;  %v1073_v33 = vpop.permute.xlu1 %1072  ;;  %v3319_v34 = vadd.f32 %v1150_v18, %v3131_v29  ;;  %v3329_v29 = vmul.f32 0.01, %v1319_v28 }
 0x500   :  { %v2856_v38 = vpop.eup %2855  ;;  %v1153_v39 = vmul.f32 %v2854_v31, %v1137_v1  ;;  %2863 = vpow2.f32 %v1116_v24  ;;  %v1118_v40 = vmul.f32 1.442695, %v1094_v25  ;;  %v1095_v41 = vmul.f32 0.5, %v1073_v33 }
 0x501   :  { %v1151_v27 = vmul.f32 %v2856_v38, %v1135_v23  ;;  %v1075_v44 = vpop.permute.xlu0 %1074  ;;  %v1184_v47 = vadd.f32 1.0, %v3316_v26  ;;  %v1182_v49 = vadd.f32 1.0, %v3319_v34  ;;  %v1141_v38 = vld [vmem:[%s3553_s1 + $0x38] sm:$0xff] }
 0x502   :  { %2865 = vpow2.f32 %v1118_v40  ;;  %v1120_v51 = vmul.f32 1.442695, %v1095_v41  ;;  %v1096_v52 = vmul.f32 0.5, %v1075_v44  ;;  %v3335_v53 = vadd.f32 %v1153_v39, %v3141_v30 }
 0x503   :  { %v1077_v54 = vpop.permute.xlu1 %1076  ;;  %v1200_v55 = vmul.f32 4.0, %v1184_v47  ;;  %v3338_v56 = vadd.f32 %v1151_v27, %v3149_v32  ;;  %v1198_v57 = vmul.f32 4.0, %v1182_v49 }
 0x504   :  { %v2858_v60 = vpop.eup %2857  ;;  %2867 = vpow2.f32 %v1120_v51  ;;  %v1122_v1 = vmul.f32 1.442695, %v1096_v52  ;;  %v1097_v2 = vmul.f32 0.5, %v1077_v54  ;;  %v1185_v6 = vadd.f32 1.0, %v3335_v53  ;;  %v1142_v51 = vld [vmem:[%s3553_s1 + $0x40] sm:$0xff] }
 0x505   :  { %v1154_v30 = vmul.f32 %v2858_v60, %v1138_v50  ;;  %v1079_v7 = vpop.permute.xlu0 %1078  ;;  %v1216_v8 = vfloor.f32 %v1200_v55  ;;  %v1183_v9 = vadd.f32 1.0, %v3338_v56  ;;  %v1214_v32 = vfloor.f32 %v1198_v57 }
 0x506   :  { %v2860_v10 = vpop.eup %2859  ;;  %2869 = vpow2.f32 %v1122_v1  ;;  %v1124_v17 = vmul.f32 1.442695, %v1097_v2  ;;  %v1098_v18 = vmul.f32 0.5, %v1079_v7  ;;  %v1201_v19 = vmul.f32 4.0, %v1185_v6  ;;  %v1143_v7 = vld [vmem:[%s3553_s1 + $0x48] sm:$0xff] }
 0x507   :  { %v1155_v23 = vmul.f32 %v2860_v10, %v1139_v63  ;;  %v1081_v24 = vpop.permute.xlu1 %1080  ;;  %v1232_v25 = vmax.f32 %v1216_v8, 0.0  ;;  %v1199_v28 = vmul.f32 4.0, %v1183_v9  ;;  %v1230_v31 = vmax.f32 %v1214_v32, 0.0 }
 0x508   :  { %v2862_v33 = vpop.eup %2861  ;;  %2871 = vpow2.f32 %v1124_v17  ;;  %v1126_v39 = vmul.f32 1.442695, %v1098_v18  ;;  %v1099_v40 = vmul.f32 0.5, %v1081_v24  ;;  %v1217_v41 = vfloor.f32 %v1201_v19  ;;  %v1144_v24 = vld [vmem:[%s3553_s1 + $0x50] sm:$0xff] }
 0x509   :  { %v1156_v42 = vmul.f32 %v2862_v33, %v1140_v12  ;;  %v1083_v27 = vpop.permute.xlu0 %1082  ;;  %v1248_v44 = vmin.f32 %v1232_v25, 7.0  ;;  %v1215_v47 = vfloor.f32 %v1199_v28  ;;  %v1246_v49 = vmin.f32 %v1230_v31, 7.0  ;;  %v2824_v33 = vld [vmem:[#allocation4 + $0x178] sm:$0xff]  }
 0x50a   :  { %v2864_v50 = vpop.eup %2863  ;;  %2873 = vpow2.f32 %v1126_v39  ;;  %v1128_v52 = vmul.f32 1.442695, %v1099_v40  ;;  %v1100_v54 = vmul.f32 0.5, %v1083_v27  ;;  %v1233_v55 = vmax.f32 %v1217_v41, 0.0  ;;  %2624 = vmatprep.subr.bf16.mxu1 %v2824_v33 }
 0x50b   :  { %v1157_v57 = vmul.f32 %v2864_v50, %v1141_v38  ;;  %v1085_v60 = vpop.permute.xlu1 %1084  ;;  %v1264_v63 = vadd.f32 0.5, %v1248_v44  ;;  %v1231_v1 = vmax.f32 %v1215_v47, 0.0  ;;  %v1262_v2 = vadd.f32 0.5, %v1246_v49  ;;  %v1145_v44 = vld [vmem:[%s3553_s1 + $0x58] sm:$0xff]  ;;  %2625 = vmatpush3.bf16.msra.mxu1 %v2824_v33 }
 0x50c   :  { %v2866_v6 = vpop.eup %2865  ;;  %2875 = vpow2.f32 %v1128_v52  ;;  %v1130_v8 = vmul.f32 1.442695, %v1100_v54  ;;  %v1101_v9 = vmul.f32 0.5, %v1085_v60  ;;  %v1249_v32 = vmin.f32 %v1233_v55, 7.0  ;;  %v1146_v55 = vld [vmem:[%s3553_s1 + $0x60] sm:$0xff] }
 0x50d   :  { %v1158_v10 = vmul.f32 %v2866_v6, %v1142_v51  ;;  %v1280_v12 = vmul.f32 0.25, %v1264_v63  ;;  %v1247_v17 = vmin.f32 %v1231_v1, 7.0  ;;  %v1278_v18 = vmul.f32 0.25, %v1262_v2 }
 0x50e   :  { %v2868_v19 = vpop.eup %2867  ;;  %2877 = vpow2.f32 %v1130_v8  ;;  %v1132_v25 = vmul.f32 1.442695, %v1101_v9  ;;  %v1265_v28 = vadd.f32 0.5, %v1249_v32  ;;  %v3363_v31 = vadd.f32 %v1154_v30, %v3169_v45 }
 0x50f   :  { %v1159_v38 = vmul.f32 %v2868_v19, %v1143_v7  ;;  %v1296_v39 = vadd.f32 -1.0, %v1280_v12  ;;  %v1263_v40 = vadd.f32 0.5, %v1247_v17  ;;  %v1294_v41 = vadd.f32 -1.0, %v1278_v18  ;;  %v1147_v7 = vld [vmem:[%s3553_s1 + $0x68] sm:$0xff] }
 0x510   :  { %v2870_v27 = vpop.eup %2869  ;;  %2879 = vpow2.f32 %v1132_v25  ;;  %v1281_v47 = vmul.f32 0.25, %v1265_v28  ;;  %v3369_v49 = vadd.f32 %v1155_v23, %v3187_v48  ;;  %v1186_v50 = vadd.f32 1.0, %v3363_v31 }
 0x511   :  { %v1160_v45 = vmul.f32 %v2870_v27, %v1144_v24  ;;  %v1344_v30 = vadd.f32 %v3300_v3, %v1296_v39  ;;  %v1279_v51 = vmul.f32 0.25, %v1263_v40  ;;  %v1342_v52 = vadd.f32 %v3304_v5, %v1294_v41 }
 0x512   :  { %v2872_v54 = vpop.eup %2871  ;;  %v1297_v60 = vadd.f32 -1.0, %v1281_v47  ;;  %v1187_v63 = vadd.f32 1.0, %v3369_v49  ;;  %v1202_v48 = vmul.f32 4.0, %v1186_v50  ;;  %v3379_v23 = vadd.f32 %v1156_v42, %v3165_v43 }
 0x513   :  { %v1161_v1 = vmul.f32 %v2872_v54, %v1145_v44  ;;  %v1295_v2 = vadd.f32 -1.0, %v1279_v51  ;;  %v3382_v3 = vadd.f32 %v1157_v57, %v3183_v46  ;;  %v3385_v5 = vadd.f32 %v1158_v10, %v3213_v61  ;;  %v1148_v10 = vld [vmem:[%s3553_s1 + $0x70] sm:$0xff] }
 0x514   :  { %v2874_v6 = vpop.eup %2873  ;;  %v1345_v8 = vadd.f32 %v3302_v4, %v1297_v60  ;;  %v1203_v9 = vmul.f32 4.0, %v1187_v63  ;;  %v1218_v32 = vfloor.f32 %v1202_v48  ;;  %v1188_v43 = vadd.f32 1.0, %v3379_v23 }
 0x515   :  { %v1162_v42 = vmul.f32 %v2874_v6, %v1146_v55  ;;  %v1343_v12 = vadd.f32 %v3306_v20, %v1295_v2  ;;  %v1189_v46 = vadd.f32 1.0, %v3382_v3  ;;  %v3395_v57 = vadd.f32 %v1159_v38, %v3231_v0  ;;  %v1149_v0 = vld [vmem:[%s3553_s1 + $0x78] sm:$0xff] }
 0x516   :  { %v2876_v61 = vpop.eup %2875  ;;  %v2749_v17 = vpack.i.bf16 %v1345_v8, %v1344_v30  ;;  %v1219_v18 = vfloor.f32 %v1203_v9  ;;  %v1234_v4 = vmax.f32 %v1218_v32, 0.0  ;;  %v1204_v19 = vmul.f32 4.0, %v1188_v43 }
 0x517   :  { %v1163_v24 = vmul.f32 %v2876_v61, %v1147_v7  ;;  %v2744_v25 = vpack.i.bf16 %v1343_v12, %v1342_v52  ;;  %v1205_v28 = vmul.f32 4.0, %v1189_v46  ;;  %v1190_v33 = vadd.f32 1.0, %v3385_v5 }
 0x518   :  { %v2878_v20 = vpop.eup %2877  ;;  %2750 = vrot.lane.b32.xlu1 %v2749_v17, %s2933_s2  ;;  %v1235_v38 = vmax.f32 %v1219_v18, 0.0  ;;  %v1250_v39 = vmin.f32 %v1234_v4, 7.0  ;;  %v1220_v40 = vfloor.f32 %v1204_v19  ;;  %v1191_v41 = vadd.f32 1.0, %v3395_v57 }
 0x519   :  { %v1164_v27 = vmul.f32 %v2878_v20, %v1148_v10  ;;  %2745 = vrot.lane.b32.xlu0 %v2744_v25, %s2933_s2  ;;  %v1221_v44 = vfloor.f32 %v1205_v28  ;;  %v1206_v47 = vmul.f32 4.0, %v1190_v33  ;;  %v3408_v50 = vadd.f32 %v1160_v45, %v3209_v59 }
 0x51a   :  { %v2880_v30 = vpop.eup %2879  ;;  %v1251_v51 = vmin.f32 %v1235_v38, 7.0  ;;  %v1266_v52 = vadd.f32 0.5, %v1250_v39  ;;  %v1236_v54 = vmax.f32 %v1220_v40, 0.0  ;;  %v1207_v55 = vmul.f32 4.0, %v1191_v41 }
 0x51b   :  { %v1165_v60 = vmul.f32 %v2880_v30, %v1149_v0  ;;  %v1237_v63 = vmax.f32 %v1221_v44, 0.0  ;;  %v1222_v48 = vfloor.f32 %v1206_v47  ;;  %v3411_v2 = vadd.f32 %v1161_v1, %v3227_v62 }
 0x51c   :  { %v1267_v6 = vadd.f32 0.5, %v1251_v51  ;;  %v1282_v7 = vmul.f32 0.25, %v1266_v52  ;;  %v1252_v8 = vmin.f32 %v1236_v54, 7.0  ;;  %v1223_v9 = vfloor.f32 %v1207_v55 }
 0x51d   :  { %v1253_v32 = vmin.f32 %v1237_v63, 7.0  ;;  %v1238_v43 = vmax.f32 %v1222_v48, 0.0  ;;  %v1192_v59 = vadd.f32 1.0, %v3408_v50  ;;  %v1193_v45 = vadd.f32 1.0, %v3411_v2 }
 0x51e   :  { %v1283_v12 = vmul.f32 0.25, %v1267_v6  ;;  %v1298_v46 = vadd.f32 -1.0, %v1282_v7  ;;  %v1268_v61 = vadd.f32 0.5, %v1252_v8  ;;  %v1239_v10 = vmax.f32 %v1223_v9, 0.0 }
 0x51f   :  { %v1269_v17 = vadd.f32 0.5, %v1253_v32  ;;  %v1254_v18 = vmin.f32 %v1238_v43, 7.0  ;;  %v1208_v4 = vmul.f32 4.0, %v1192_v59  ;;  %v1209_v19 = vmul.f32 4.0, %v1193_v45 }
 0x520   :  { %v1299_v62 = vadd.f32 -1.0, %v1283_v12  ;;  %v1346_v1 = vadd.f32 %v3308_v21, %v1298_v46  ;;  %v1284_v25 = vmul.f32 0.25, %v1268_v61  ;;  %v1255_v28 = vmin.f32 %v1239_v10, 7.0 }
 0x521   :  { %v1285_v33 = vmul.f32 0.25, %v1269_v17  ;;  %v1270_v20 = vadd.f32 0.5, %v1254_v18  ;;  %v1224_v0 = vfloor.f32 %v1208_v4  ;;  %v1225_v38 = vfloor.f32 %v1209_v19 }
 0x522   :  { %v1347_v39 = vadd.f32 %v3310_v22, %v1299_v62  ;;  %v1300_v40 = vadd.f32 -1.0, %v1284_v25  ;;  %v1271_v41 = vadd.f32 0.5, %v1255_v28  ;;  %v3418_v44 = vadd.f32 %v1162_v42, %v3257_v13  ;;  %v1321_v42 = vld [vmem:[#allocation2 + $0x58] sm:$0xff] }
 0x523   :  { %v1301_v47 = vadd.f32 -1.0, %v1285_v33  ;;  %v1286_v30 = vmul.f32 0.25, %v1270_v20  ;;  %v1240_v51 = vmax.f32 %v1224_v0, 0.0  ;;  %v1241_v52 = vmax.f32 %v1225_v38, 0.0  ;;  %v1322_v0 = vld [vmem:[#allocation2 + $0x60] sm:$0xff] }
 0x524   :  { %v2754_v54 = vpack.i.bf16 %v1347_v39, %v1346_v1  ;;  %v1348_v21 = vadd.f32 %v3321_v35, %v1300_v40  ;;  %v1287_v55 = vmul.f32 0.25, %v1271_v41  ;;  %v3422_v63 = vadd.f32 %v1163_v24, %v3275_v16  ;;  %v1323_v40 = vld [vmem:[#allocation2 + $0x68] sm:$0xff] }
 0x525   :  { %v1349_v48 = vadd.f32 %v3323_v36, %v1301_v47  ;;  %v1302_v6 = vadd.f32 -1.0, %v1286_v30  ;;  %v1256_v22 = vmin.f32 %v1240_v51, 7.0  ;;  %v1257_v7 = vmin.f32 %v1241_v52, 7.0 }
 0x526   :  { %2755 = vrot.lane.b32.xlu0 %v2754_v54, %s2933_s2  ;;  %v1303_v13 = vadd.f32 -1.0, %v1287_v55  ;;  %v1194_v8 = vadd.f32 1.0, %v3418_v44  ;;  %v1195_v9 = vadd.f32 1.0, %v3422_v63  ;;  %v3429_v32 = vadd.f32 %v1164_v27, %v3253_v11 }
 0x527   :  { %v2759_v35 = vpack.i.bf16 %v1349_v48, %v1348_v21  ;;  %v1350_v16 = vadd.f32 %v3325_v37, %v1302_v6  ;;  %v1272_v24 = vadd.f32 0.5, %v1256_v22  ;;  %v1273_v43 = vadd.f32 0.5, %v1257_v7  ;;  %v1324_v6 = vld [vmem:[#allocation2 + $0x70] sm:$0xff]  ;;  %v1325_v7 = vld [vmem:[#allocation2 + $0x78] sm:$0xff] }
 0x528   :  { %v1351_v36 = vadd.f32 %v3329_v29, %v1303_v13  ;;  %v1210_v59 = vmul.f32 4.0, %v1194_v8  ;;  %v1211_v45 = vmul.f32 4.0, %v1195_v9  ;;  %v3434_v12 = vadd.f32 %v1165_v60, %v3271_v14 }
 0x529   :  { %2760 = vrot.lane.b32.xlu1 %v2759_v35, %s2933_s2  ;;  %v1288_v46 = vmul.f32 0.25, %v1272_v24  ;;  %v1289_v61 = vmul.f32 0.25, %v1273_v43  ;;  %v1337_v10 = vmul.f32 0.01, %v1321_v42  ;;  %v1196_v11 = vadd.f32 1.0, %v3429_v32 }
 0x52a   :  { %v2764_v27 = vpack.i.bf16 %v1351_v36, %v1350_v16  ;;  %v1226_v17 = vfloor.f32 %v1210_v59  ;;  %v1227_v18 = vfloor.f32 %v1211_v45  ;;  %v1197_v37 = vadd.f32 1.0, %v3434_v12  ;;  %v2825_v59 = vld [vmem:[#allocation4 + $0x180] sm:$0xff]   ;;  %v2826_v45 = vld [vmem:[#allocation4 + $0x188] sm:$0xff]  }
 0x52b   :  { %v1304_v4 = vadd.f32 -1.0, %v1288_v46  ;;  %v1305_v19 = vadd.f32 -1.0, %v1289_v61  ;;  %v1212_v29 = vmul.f32 4.0, %v1196_v11  ;;  %v1338_v52 = vmul.f32 0.01, %v1322_v0  ;;  %2642 = vmatprep.subr.bf16.mxu0 %v2825_v59 }
 0x52c   :  { %2765 = vrot.lane.b32.xlu0 %v2764_v27, %s2933_s2  ;;  %v1242_v62 = vmax.f32 %v1226_v17, 0.0  ;;  %v1243_v14 = vmax.f32 %v1227_v18, 0.0  ;;  %v1213_v60 = vmul.f32 4.0, %v1197_v37  ;;  %v1339_v48 = vmul.f32 0.01, %v1323_v40  ;;  %2643 = vmatpush3.bf16.msra.mxu0 %v2825_v59  ;;  %v2827_v17 = vld [vmem:[#allocation4 + $0x190] sm:$0xff]  }
 0x52d   :  { %v1352_v1 = vadd.f32 %v3340_v58, %v1304_v4  ;;  %v1353_v25 = vadd.f32 %v1337_v10, %v1305_v19  ;;  %v1228_v28 = vfloor.f32 %v1212_v29  ;;  %v1340_v35 = vmul.f32 0.01, %v1324_v6  ;;  %2644 = vmatprep.subr.bf16.mxu0 %v2826_v45  ;;  %v2828_v37 = vld [vmem:[#allocation4 + $0x198] sm:$0xff]   ;;  %v2829_v4 = vld [vmem:[#allocation4 + $0x1a0] sm:$0xff]   ;;  %v2830_v19 = vld [vmem:[#allocation4 + $0x1a8] sm:$0xff]  }
 0x52e   :  { %v1258_v33 = vmin.f32 %v1242_v62, 7.0  ;;  %v1259_v20 = vmin.f32 %v1243_v14, 7.0  ;;  %v1229_v38 = vfloor.f32 %v1213_v60  ;;  %v1341_v36 = vmul.f32 0.01, %v1325_v7 }
 0x52f   :  { %v2769_v39 = vpack.i.bf16 %v1353_v25, %v1352_v1  ;;  %v1244_v41 = vmax.f32 %v1228_v28, 0.0 }
 0x530   :  { %v1274_v47 = vadd.f32 0.5, %v1258_v33  ;;  %v1275_v30 = vadd.f32 0.5, %v1259_v20  ;;  %v1245_v51 = vmax.f32 %v1229_v38, 0.0  ;;  %2645 = vmatpush3.bf16.msra.mxu0 %v2826_v45  ;;  %v2832_v45 = vld [vmem:[#allocation4 + $0x1b8] sm:$0xff]  }
 0x531   :  { %2770 = vrot.lane.b32.xlu1 %v2769_v39, %s2933_s2  ;;  %v1260_v54 = vmin.f32 %v1244_v41, 7.0  ;;  %2646 = vmatprep.subr.bf16.mxu0 %v2827_v17 }
 0x532   :  { %v1290_v21 = vmul.f32 0.25, %v1274_v47  ;;  %v1291_v55 = vmul.f32 0.25, %v1275_v30  ;;  %v1261_v58 = vmin.f32 %v1245_v51, 7.0 }
 0x533   :  { %v1276_v22 = vadd.f32 0.5, %v1260_v54 }
 0x534   :  { %v1306_v13 = vadd.f32 -1.0, %v1290_v21  ;;  %v1307_v42 = vadd.f32 -1.0, %v1291_v55  ;;  %v1277_v8 = vadd.f32 0.5, %v1261_v58  ;;  %2647 = vmatpush3.bf16.msra.mxu0 %v2827_v17 }
 0x535   :  { %v1292_v9 = vmul.f32 0.25, %v1276_v22  ;;  %2648 = vmatprep.subr.bf16.mxu0 %v2828_v37 }
 0x536   :  { %v1354_v16 = vadd.f32 %v1338_v52, %v1306_v13  ;;  %v1355_v24 = vadd.f32 %v1339_v48, %v1307_v42  ;;  %v1293_v43 = vmul.f32 0.25, %v1277_v8 }
 0x537   :  { %v1308_v46 = vadd.f32 -1.0, %v1292_v9 }
 0x538   :  { %v2774_v61 = vpack.i.bf16 %v1355_v24, %v1354_v16  ;;  %v1309_v10 = vadd.f32 -1.0, %v1293_v43  ;;  %2649 = vmatpush3.bf16.msra.mxu0 %v2828_v37 }
 0x539   :  { %v1356_v11 = vadd.f32 %v1340_v35, %v1308_v46  ;;  %2650 = vmatprep.subr.bf16.mxu0 %v2829_v4  ;;  %v2834_v46 = vld [vmem:[#allocation4 + $0x1c8] sm:$0xff]  }
 0x53a   :  { %2775 = vrot.lane.b32.xlu0 %v2774_v61, %s2933_s2  ;;  %v1357_v27 = vadd.f32 %v1341_v36, %v1309_v10  ;;  %v2835_v61 = vld [vmem:[#allocation4 + $0x1d0] sm:$0xff]   ;;  %v2272_v10 = vld [vmem:[%s3556_s4 + $0x5] ss:$0 sm:$0xff] }
 0x53c   :  { %v2779_v18 = vpack.i.bf16 %v1357_v27, %v1356_v11  ;;  %2651 = vmatpush3.bf16.msra.mxu0 %v2829_v4 }
 0x53d   :  { %2652 = vmatprep.subr.bf16.mxu0 %v2830_v19 }
 0x53e   :  { %2780 = vrot.lane.b32.xlu1 %v2779_v18, %s2933_s2 }
 0x540   :  { %2653 = vmatpush3.bf16.msra.mxu0 %v2830_v19 }
 0x58a   :  { %v2751_v29 = vpop.permute.xlu1 %2750 }
 0x58b   :  { %v2753_v62 = vunpack.i.h.bf16 %v2751_v29  ;;  %v2752_v14 = vunpack.i.l.bf16 %v2751_v29  ;;  %v2746_v60 = vpop.permute.xlu0 %2745 }
 0x58c   :  { %v2748_v1 = vunpack.i.h.bf16 %v2746_v60  ;;  %v2747_v25 = vunpack.i.l.bf16 %v2746_v60 }
 0x58d   :  { %v1393_v28 = vsel %vm988_vm1, %v3335_v53, %v2753_v62  ;;  %v1392_v33 = vsel %vm988_vm1, %v3316_v26, %v2752_v14 }
 0x58e   :  { %v1390_v20 = vsel %vm988_vm1, %v3319_v34, %v2747_v25  ;;  %v1391_v0 = vsel %vm988_vm1, %v3338_v56, %v2748_v1  ;;  %v1407_v39 = vpack.c.bf16 %v1393_v28, %v1392_v33 }
 0x58f   :  { %v1406_v38 = vpack.c.bf16 %v1391_v0, %v1390_v20 }
 0x591   :  { %2626 = vmatprep.mubr.bf16.mxu1 %v1406_v38 }
 0x592   :  { %2627 = vmatmul.mubr.bf16.vlgmr.msra.gmra.mrb[32].mxu1 %v1407_v39 }
 0x598   :  { %v2756_v40 = vpop.permute.xlu0 %2755 }
 0x599   :  { %v2758_v41 = vunpack.i.h.bf16 %v2756_v40  ;;  %v2757_v47 = vunpack.i.l.bf16 %v2756_v40 }
 0x59b   :  { %v2761_v53 = vpop.permute.xlu1 %2760  ;;  %v1394_v26 = vsel %vm988_vm1, %v3363_v31, %v2757_v47  ;;  %v1395_v34 = vsel %vm988_vm1, %v3369_v49, %v2758_v41 }
 0x59c   :  { %v2763_v30 = vunpack.i.h.bf16 %v2761_v53  ;;  %v2762_v51 = vunpack.i.l.bf16 %v2761_v53  ;;  %v1408_v52 = vpack.c.bf16 %v1395_v34, %v1394_v26 }
 0x59e   :  { %2630 = vmatprep.mubr.bf16.mxu1 %v1408_v52  ;;  %v2766_v56 = vpop.permute.xlu0 %2765  ;;  %v1396_v54 = vsel %vm988_vm1, %v3379_v23, %v2762_v51  ;;  %v1397_v21 = vsel %vm988_vm1, %v3382_v3, %v2763_v30 }
 0x59f   :  { %v2768_v55 = vunpack.i.h.bf16 %v2766_v56  ;;  %v2767_v48 = vunpack.i.l.bf16 %v2766_v56  ;;  %v1409_v31 = vpack.c.bf16 %v1397_v21, %v1396_v54 }
 0x5a1   :  { %2631 = vmatmul.mubr.bf16.gmra.mrb[36].mxu1 %v1409_v31  ;;  %v1398_v49 = vsel %vm988_vm1, %v3385_v5, %v2767_v48  ;;  %v1399_v58 = vsel %vm988_vm1, %v3395_v57, %v2768_v55 }
 0x5a2   :  { %v1410_v6 = vpack.c.bf16 %v1399_v58, %v1398_v49 }
 0x5a3   :  { %v2771_v22 = vpop.permute.xlu1 %2770 }
 0x5a4   :  { %v2773_v7 = vunpack.i.h.bf16 %v2771_v22  ;;  %v2772_v23 = vunpack.i.l.bf16 %v2771_v22  ;;  %2634 = vmatprep.mubr.bf16.mxu1 %v1410_v6 }
 0x5a6   :  { %v1400_v3 = vsel %vm988_vm1, %v3408_v50, %v2772_v23  ;;  %v1401_v13 = vsel %vm988_vm1, %v3411_v2, %v2773_v7 }
 0x5a7   :  { %v1411_v42 = vpack.c.bf16 %v1401_v13, %v1400_v3 }
 0x5a9   :  { %2635 = vmatmul.mubr.bf16.gmra.mrb[40].mxu1 %v1411_v42 }
 0x5ac   :  { %v2776_v5 = vpop.permute.xlu0 %2775 }
 0x5ad   :  { %v2778_v8 = vunpack.i.h.bf16 %v2776_v5  ;;  %v2777_v9 = vunpack.i.l.bf16 %v2776_v5 }
 0x5af   :  { %v1402_v57 = vsel %vm988_vm1, %v3418_v44, %v2777_v9  ;;  %v1403_v35 = vsel %vm988_vm1, %v3422_v63, %v2778_v8  ;;  %v2831_v44 = vld [vmem:[#allocation4 + $0x1b0] sm:$0xff]   ;;  %v2833_v63 = vld [vmem:[#allocation4 + $0x1c0] sm:$0xff]  }
 0x5b0   :  { %v2781_v16 = vpop.permute.xlu1 %2780  ;;  %v1412_v24 = vpack.c.bf16 %v1403_v35, %v1402_v57  ;;  %2654 = vmatprep.subr.bf16.mxu0 %v2831_v44  ;;  %2674 = vmatprep.subr.bf16.mxu1 %v2833_v63 }
 0x5b1   :  { %v2783_v50 = vunpack.i.h.bf16 %v2781_v16  ;;  %v2782_v43 = vunpack.i.l.bf16 %v2781_v16  ;;  %2655 = vmatpush3.bf16.msra.mxu0 %v2831_v44  ;;  %2675 = vmatpush3.bf16.msra.mxu1 %v2833_v63  ;;  %v2840_v63 = vld [vmem:[#allocation4 + $0x1f8] sm:$0xff]  }
 0x5b2   :  { %2638 = vmatprep.mubr.bf16.mxu1 %v1412_v24  ;;  %2656 = vmatprep.subr.bf16.mxu0 %v2832_v45 }
 0x5b3   :  { %v1404_v2 = vsel %vm988_vm1, %v3429_v32, %v2782_v43  ;;  %v1405_v36 = vsel %vm988_vm1, %v3434_v12, %v2783_v50  ;;  %2676 = vmatprep.subr.bf16.mxu1 %v2834_v46  ;;  %v2836_v32 = vld [vmem:[#allocation4 + $0x1d8] sm:$0xff]   ;;  %v2838_v12 = vld [vmem:[#allocation4 + $0x1e8] sm:$0xff]  }
 0x5b4   :  { %v1413_v59 = vpack.c.bf16 %v1405_v36, %v1404_v2 }
 0x5b5   :  { %2657 = vmatpush3.bf16.msra.mxu0 %v2832_v45  ;;  %2677 = vmatpush3.bf16.msra.mxu1 %v2834_v46  ;;  %v2839_v45 = vld [vmem:[#allocation4 + $0x1f0] sm:$0xff]   ;;  %v2841_v46 = vld [vmem:[#allocation4 + $0x200] sm:$0xff]  }
 0x5b6   :  { %2639 = vmatmul.mubr.bf16.gmra.mrb[44].mxu1 %v1413_v59  ;;  %2678 = vmatprep.subr.bf16.mxu1 %v2835_v61 }
 0x5b7   :  { %2706 = vmatprep.subr.bf16.mxu0 %v2841_v46 }
 0x5b9   :  { %2679 = vmatpush3.bf16.msra.mxu1 %v2835_v61  ;;  %v2842_v61 = vld [vmem:[#allocation4 + $0x208] sm:$0xff]  }
 0x5ba   :  { %2680 = vmatprep.subr.bf16.mxu1 %v2836_v32 }
 0x5bd   :  { %2681 = vmatpush3.bf16.msra.mxu1 %v2836_v32  ;;  %v2843_v32 = vld [vmem:[#allocation4 + $0x210] sm:$0xff]  }
 0x5be   :  { %2682 = vmatprep.subr.bf16.mxu1 %v2837_v15 }
 0x5c1   :  { %2683 = vmatpush3.bf16.msra.mxu1 %v2837_v15  ;;  %v2844_v15 = vld [vmem:[#allocation4 + $0x218] sm:$0xff]  }
 0x5c2   :  { %2684 = vmatprep.subr.bf16.mxu1 %v2838_v12 }
 0x5c5   :  { %2685 = vmatpush3.bf16.msra.mxu1 %v2838_v12  ;;  %v2845_v12 = vld [vmem:[#allocation4 + $0x220] sm:$0xff]  }
 0x5c6   :  { %2686 = vmatprep.subr.bf16.mxu1 %v2839_v45 }
 0x5c9   :  { %2687 = vmatpush3.bf16.msra.mxu1 %v2839_v45 }
 0x5ca   :  { %2688 = vmatprep.subr.bf16.mxu1 %v2840_v63 }
 0x5cd   :  { %2689 = vmatpush3.bf16.msra.mxu1 %v2840_v63  ;;  %v2847_v63 = vld [vmem:[#allocation4 + $0x230] sm:$0xff]  }
 0x665   :  { %v2628_v11 = vpop.f32.mrb[32].mxu1 }
 0x666   :  { %v1530_v27 = vadd.f32 %v2628_v11, %v2272_v10  ;;  %v1521_v17 = vpop.f32.mrb[33].mxu1  ;;  %v2282_v11 = vld [vmem:[%s3556_s4 + $0x6] ss:$0 sm:$0xff] }
 0x667   :  { %v1522_v18 = vadd.f32 %v2272_v10, %v1521_v17  ;;  %v2629_v37 = vpop.f32.mrb[34].mxu1 }
 0x668   :  { %v1533_v4 = vadd.f32 %v2629_v37, %v2272_v10  ;;  %v1524_v19 = vpop.f32.mrb[35].mxu1  ;;  %v1586_v62 = vmax.f32 %v1530_v27, 0.0 }
 0x669   :  { %v1525_v29 = vadd.f32 %v2272_v10, %v1524_v19  ;;  %v1584_v60 = vmax.f32 %v1522_v18, 0.0 }
 0x66a   :  { %v1587_v14 = vmax.f32 %v1533_v4, 0.0 }
 0x66b   :  { %v1585_v1 = vmax.f32 %v1525_v29, 0.0 }
 0x66c   :  { %v1601_v25 = vpack.c.bf16 %v1587_v14, %v1586_v62 }
 0x66d   :  { %v1600_v28 = vpack.c.bf16 %v1585_v1, %v1584_v60 }
 0x66f   :  { %2658 = vmatprep.mubr.bf16.mxu0 %v1600_v28 }
 0x670   :  { %2659 = vmatmul.mubr.bf16.vlgmr.msra.gmra.mrb[48].mxu0 %v1601_v25 }
 0x671   :  { %2707 = vmatpush3.bf16.msra.mxu0 %v2841_v46  ;;  %v2848_v46 = vld [vmem:[#allocation4 + $0x238] sm:$0xff]  }
 0x672   :  { %2708 = vmatprep.subr.bf16.mxu0 %v2842_v61 }
 0x674   :  { %v2632_v33 = vpop.f32.mrb[36].mxu1 }
 0x675   :  { %v1546_v20 = vadd.f32 %v2632_v33, %v2272_v10  ;;  %v1537_v0 = vpop.f32.mrb[37].mxu1  ;;  %2709 = vmatpush3.bf16.msra.mxu0 %v2842_v61  ;;  %v2292_v61 = vld [vmem:[%s3556_s4 + $0x7] ss:$0 sm:$0xff] }
 0x676   :  { %v1538_v38 = vadd.f32 %v2272_v10, %v1537_v0  ;;  %v2633_v39 = vpop.f32.mrb[38].mxu1  ;;  %2710 = vmatprep.subr.bf16.mxu0 %v2843_v32 }
 0x677   :  { %v1549_v40 = vadd.f32 %v2633_v39, %v2272_v10  ;;  %v1540_v41 = vpop.f32.mrb[39].mxu1  ;;  %v1590_v53 = vmax.f32 %v1546_v20, 0.0 }
 0x678   :  { %v1541_v47 = vadd.f32 %v2272_v10, %v1540_v41  ;;  %v1588_v34 = vmax.f32 %v1538_v38, 0.0 }
 0x679   :  { %v1591_v26 = vmax.f32 %v1549_v40, 0.0  ;;  %2711 = vmatpush3.bf16.msra.mxu0 %v2843_v32 }
 0x67a   :  { %v1589_v30 = vmax.f32 %v1541_v47, 0.0  ;;  %2712 = vmatprep.subr.bf16.mxu0 %v2844_v15 }
 0x67b   :  { %v1603_v51 = vpack.c.bf16 %v1591_v26, %v1590_v53 }
 0x67c   :  { %v1602_v52 = vpack.c.bf16 %v1589_v30, %v1588_v34  ;;  %v2636_v56 = vpop.f32.mrb[40].mxu1 }
 0x67d   :  { %v1562_v54 = vadd.f32 %v2636_v56, %v2272_v10  ;;  %v1553_v21 = vpop.f32.mrb[41].mxu1  ;;  %2713 = vmatpush3.bf16.msra.mxu0 %v2844_v15 }
 0x67e   :  { %v1554_v55 = vadd.f32 %v2272_v10, %v1553_v21  ;;  %v2637_v48 = vpop.f32.mrb[42].mxu1  ;;  %2662 = vmatprep.mubr.bf16.mxu0 %v1602_v52  ;;  %2714 = vmatprep.subr.bf16.mxu0 %v2845_v12 }
 0x67f   :  { %v1565_v31 = vadd.f32 %v2637_v48, %v2272_v10  ;;  %v1556_v49 = vpop.f32.mrb[43].mxu1  ;;  %2663 = vmatmul.mubr.bf16.gmra.mrb[52].mxu0 %v1603_v51  ;;  %v1594_v6 = vmax.f32 %v1562_v54, 0.0 }
 0x680   :  { %v1557_v58 = vadd.f32 %v2272_v10, %v1556_v49  ;;  %v1592_v7 = vmax.f32 %v1554_v55, 0.0 }
 0x681   :  { %v1595_v22 = vmax.f32 %v1565_v31, 0.0  ;;  %2715 = vmatpush3.bf16.msra.mxu0 %v2845_v12 }
 0x682   :  { %v1593_v23 = vmax.f32 %v1557_v58, 0.0 }
 0x683   :  { %v1605_v3 = vpack.c.bf16 %v1595_v22, %v1594_v6 }
 0x684   :  { %v1604_v13 = vpack.c.bf16 %v1593_v23, %v1592_v7 }
 0x686   :  { %2666 = vmatprep.mubr.bf16.mxu0 %v1604_v13 }
 0x687   :  { %2667 = vmatmul.mubr.bf16.gmra.mrb[56].mxu0 %v1605_v3 }
 0x689   :  { %v2640_v42 = vpop.f32.mrb[44].mxu1 }
 0x68a   :  { %v1578_v5 = vadd.f32 %v2640_v42, %v2272_v10  ;;  %v1569_v8 = vpop.f32.mrb[45].mxu1 }
 0x68b   :  { %v1570_v9 = vadd.f32 %v2272_v10, %v1569_v8  ;;  %v2641_v57 = vpop.f32.mrb[46].mxu1 }
 0x68c   :  { %v1581_v35 = vadd.f32 %v2641_v57, %v2272_v10  ;;  %v1572_v16 = vpop.f32.mrb[47].mxu1  ;;  %v1598_v50 = vmax.f32 %v1578_v5, 0.0 }
 0x68d   :  { %v1573_v24 = vadd.f32 %v2272_v10, %v1572_v16  ;;  %v1596_v2 = vmax.f32 %v1570_v9, 0.0  ;;  %v2846_v10 = vld [vmem:[#allocation4 + $0x228] sm:$0xff]  }
 0x68e   :  { %v1599_v43 = vmax.f32 %v1581_v35, 0.0  ;;  %2716 = vmatprep.subr.bf16.mxu0 %v2846_v10 }
 0x68f   :  { %v1597_v36 = vmax.f32 %v1573_v24, 0.0  ;;  %2717 = vmatpush3.bf16.msra.mxu0 %v2846_v10 }
 0x690   :  { %v1607_v59 = vpack.c.bf16 %v1599_v43, %v1598_v50  ;;  %2718 = vmatprep.subr.bf16.mxu0 %v2847_v63 }
 0x691   :  { %v1606_v44 = vpack.c.bf16 %v1597_v36, %v1596_v2 }
 0x693   :  { %2670 = vmatprep.mubr.bf16.mxu0 %v1606_v44  ;;  %2719 = vmatpush3.bf16.msra.mxu0 %v2847_v63 }
 0x694   :  { %2671 = vmatmul.mubr.bf16.gmra.mrb[60].mxu0 %v1607_v59  ;;  %2720 = vmatprep.subr.bf16.mxu0 %v2848_v46 }
 0x697   :  { %2721 = vmatpush3.bf16.msra.mxu0 %v2848_v46 }
 0x743   :  { %v2660_v27 = vpop.f32.mrb[48].mxu0 }
 0x744   :  { %v1724_v17 = vadd.f32 %v2660_v27, %v2282_v11  ;;  %v1715_v18 = vpop.f32.mrb[49].mxu0 }
 0x745   :  { %v1716_v37 = vadd.f32 %v2282_v11, %v1715_v18  ;;  %v2661_v4 = vpop.f32.mrb[50].mxu0 }
 0x746   :  { %v1727_v19 = vadd.f32 %v2661_v4, %v2282_v11  ;;  %v1718_v29 = vpop.f32.mrb[51].mxu0  ;;  %v1780_v14 = vmax.f32 %v1724_v17, 0.0 }
 0x747   :  { %v1719_v62 = vadd.f32 %v2282_v11, %v1718_v29  ;;  %v1778_v1 = vmax.f32 %v1716_v37, 0.0 }
 0x748   :  { %v1781_v60 = vmax.f32 %v1727_v19, 0.0 }
 0x749   :  { %v1779_v25 = vmax.f32 %v1719_v62, 0.0 }
 0x74a   :  { %v1795_v28 = vpack.c.bf16 %v1781_v60, %v1780_v14 }
 0x74b   :  { %v1794_v33 = vpack.c.bf16 %v1779_v25, %v1778_v1 }
 0x74d   :  { %2690 = vmatprep.mubr.bf16.mxu1 %v1794_v33 }
 0x74e   :  { %2691 = vmatmul.mubr.bf16.vlgmr.msra.gmra.mrb[48].mxu1 %v1795_v28 }
 0x752   :  { %v2664_v20 = vpop.f32.mrb[52].mxu0 }
 0x753   :  { %v1740_v0 = vadd.f32 %v2664_v20, %v2282_v11  ;;  %v1731_v38 = vpop.f32.mrb[53].mxu0 }
 0x754   :  { %v1732_v39 = vadd.f32 %v2282_v11, %v1731_v38  ;;  %v2665_v40 = vpop.f32.mrb[54].mxu0 }
 0x755   :  { %v1743_v41 = vadd.f32 %v2665_v40, %v2282_v11  ;;  %v1734_v47 = vpop.f32.mrb[55].mxu0  ;;  %v1784_v26 = vmax.f32 %v1740_v0, 0.0 }
 0x756   :  { %v1735_v53 = vadd.f32 %v2282_v11, %v1734_v47  ;;  %v1782_v30 = vmax.f32 %v1732_v39, 0.0 }
 0x757   :  { %v1785_v34 = vmax.f32 %v1743_v41, 0.0 }
 0x758   :  { %v1783_v51 = vmax.f32 %v1735_v53, 0.0 }
 0x759   :  { %v1797_v52 = vpack.c.bf16 %v1785_v34, %v1784_v26 }
 0x75a   :  { %v1796_v56 = vpack.c.bf16 %v1783_v51, %v1782_v30  ;;  %v2668_v54 = vpop.f32.mrb[56].mxu0 }
 0x75b   :  { %v1756_v21 = vadd.f32 %v2668_v54, %v2282_v11  ;;  %v1747_v55 = vpop.f32.mrb[57].mxu0 }
 0x75c   :  { %v1748_v48 = vadd.f32 %v2282_v11, %v1747_v55  ;;  %v2669_v31 = vpop.f32.mrb[58].mxu0  ;;  %2694 = vmatprep.mubr.bf16.mxu1 %v1796_v56 }
 0x75d   :  { %v1759_v49 = vadd.f32 %v2669_v31, %v2282_v11  ;;  %v1750_v58 = vpop.f32.mrb[59].mxu0  ;;  %2695 = vmatmul.mubr.bf16.gmra.mrb[52].mxu1 %v1797_v52  ;;  %v1788_v22 = vmax.f32 %v1756_v21, 0.0 }
 0x75e   :  { %v1751_v6 = vadd.f32 %v2282_v11, %v1750_v58  ;;  %v1786_v23 = vmax.f32 %v1748_v48, 0.0 }
 0x75f   :  { %v1789_v7 = vmax.f32 %v1759_v49, 0.0 }
 0x760   :  { %v1787_v3 = vmax.f32 %v1751_v6, 0.0 }
 0x761   :  { %v1799_v13 = vpack.c.bf16 %v1789_v7, %v1788_v22 }
 0x762   :  { %v1798_v42 = vpack.c.bf16 %v1787_v3, %v1786_v23 }
 0x764   :  { %2698 = vmatprep.mubr.bf16.mxu1 %v1798_v42 }
 0x765   :  { %2699 = vmatmul.mubr.bf16.gmra.mrb[56].mxu1 %v1799_v13 }
 0x767   :  { %v2672_v5 = vpop.f32.mrb[60].mxu0 }
 0x768   :  { %v1772_v8 = vadd.f32 %v2672_v5, %v2282_v11  ;;  %v1763_v9 = vpop.f32.mrb[61].mxu0 }
 0x769   :  { %v1764_v57 = vadd.f32 %v2282_v11, %v1763_v9  ;;  %v2673_v35 = vpop.f32.mrb[62].mxu0 }
 0x76a   :  { %v1775_v16 = vadd.f32 %v2673_v35, %v2282_v11  ;;  %v1766_v24 = vpop.f32.mrb[63].mxu0  ;;  %v1792_v43 = vmax.f32 %v1772_v8, 0.0 }
 0x76b   :  { %v1767_v50 = vadd.f32 %v2282_v11, %v1766_v24  ;;  %v1790_v36 = vmax.f32 %v1764_v57, 0.0 }
 0x76c   :  { %v1793_v2 = vmax.f32 %v1775_v16, 0.0 }
 0x76d   :  { %v1791_v59 = vmax.f32 %v1767_v50, 0.0 }
 0x76e   :  { %v1801_v44 = vpack.c.bf16 %v1793_v2, %v1792_v43  ;;  %v2302_v2 = vld [vmem:[%s3556_s4 + $0x8] ss:$0 sm:$0xff] }
 0x76f   :  { %v1800_v45 = vpack.c.bf16 %v1791_v59, %v1790_v36 }
 0x771   :  { %2702 = vmatprep.mubr.bf16.mxu1 %v1800_v45 }
 0x772   :  { %2703 = vmatmul.mubr.bf16.gmra.mrb[60].mxu1 %v1801_v44 }
 0x821   :  { %v2692_v32 = vpop.f32.mrb[48].mxu1 }
 0x822   :  { %v1918_v15 = vadd.f32 %v2692_v32, %v2292_v61  ;;  %v1909_v12 = vpop.f32.mrb[49].mxu1 }
 0x823   :  { %v1910_v10 = vadd.f32 %v2292_v61, %v1909_v12  ;;  %v2693_v11 = vpop.f32.mrb[50].mxu1 }
 0x824   :  { %v1921_v27 = vadd.f32 %v2693_v11, %v2292_v61  ;;  %v1912_v17 = vpop.f32.mrb[51].mxu1  ;;  %v1974_v37 = vmax.f32 %v1918_v15, 0.0 }
 0x825   :  { %v1913_v18 = vadd.f32 %v2292_v61, %v1912_v17  ;;  %v1972_v19 = vmax.f32 %v1910_v10, 0.0 }
 0x826   :  { %v1975_v4 = vmax.f32 %v1921_v27, 0.0 }
 0x827   :  { %v1973_v29 = vmax.f32 %v1913_v18, 0.0 }
 0x828   :  { %v1989_v62 = vpack.c.bf16 %v1975_v4, %v1974_v37 }
 0x829   :  { %v1988_v14 = vpack.c.bf16 %v1973_v29, %v1972_v19 }
 0x82b   :  { %2722 = vmatprep.mubr.bf16.mxu0 %v1988_v14 }
 0x82c   :  { %2723 = vmatmul.mubr.bf16.vlgmr.msra.gmra.mrb[64].mxu0 %v1989_v62 }
 0x830   :  { %v2696_v60 = vpop.f32.mrb[52].mxu1 }
 0x831   :  { %v1934_v1 = vadd.f32 %v2696_v60, %v2292_v61  ;;  %v1925_v25 = vpop.f32.mrb[53].mxu1 }
 0x832   :  { %v1926_v28 = vadd.f32 %v2292_v61, %v1925_v25  ;;  %v2697_v33 = vpop.f32.mrb[54].mxu1 }
 0x833   :  { %v1937_v20 = vadd.f32 %v2697_v33, %v2292_v61  ;;  %v1928_v0 = vpop.f32.mrb[55].mxu1  ;;  %v1978_v39 = vmax.f32 %v1934_v1, 0.0 }
 0x834   :  { %v1929_v38 = vadd.f32 %v2292_v61, %v1928_v0  ;;  %v1976_v41 = vmax.f32 %v1926_v28, 0.0 }
 0x835   :  { %v1979_v40 = vmax.f32 %v1937_v20, 0.0 }
 0x836   :  { %v1977_v47 = vmax.f32 %v1929_v38, 0.0 }
 0x837   :  { %v1991_v53 = vpack.c.bf16 %v1979_v40, %v1978_v39 }
 0x838   :  { %v1990_v26 = vpack.c.bf16 %v1977_v47, %v1976_v41  ;;  %v2700_v34 = vpop.f32.mrb[56].mxu1 }
 0x839   :  { %v1950_v30 = vadd.f32 %v2700_v34, %v2292_v61  ;;  %v1941_v51 = vpop.f32.mrb[57].mxu1 }
 0x83a   :  { %v1942_v52 = vadd.f32 %v2292_v61, %v1941_v51  ;;  %v2701_v56 = vpop.f32.mrb[58].mxu1  ;;  %2726 = vmatprep.mubr.bf16.mxu0 %v1990_v26 }
 0x83b   :  { %v1953_v54 = vadd.f32 %v2701_v56, %v2292_v61  ;;  %v1944_v21 = vpop.f32.mrb[59].mxu1  ;;  %2727 = vmatmul.mubr.bf16.gmra.mrb[68].mxu0 %v1991_v53  ;;  %v1982_v48 = vmax.f32 %v1950_v30, 0.0 }
 0x83c   :  { %v1945_v55 = vadd.f32 %v2292_v61, %v1944_v21  ;;  %v1980_v49 = vmax.f32 %v1942_v52, 0.0 }
 0x83d   :  { %v1983_v31 = vmax.f32 %v1953_v54, 0.0 }
 0x83e   :  { %v1981_v58 = vmax.f32 %v1945_v55, 0.0 }
 0x83f   :  { %v1993_v6 = vpack.c.bf16 %v1983_v31, %v1982_v48 }
 0x840   :  { %v1992_v22 = vpack.c.bf16 %v1981_v58, %v1980_v49 }
 0x842   :  { %2730 = vmatprep.mubr.bf16.mxu0 %v1992_v22 }
 0x843   :  { %2731 = vmatmul.mubr.bf16.gmra.mrb[72].mxu0 %v1993_v6 }
 0x845   :  { %v2704_v7 = vpop.f32.mrb[60].mxu1 }
 0x846   :  { %v1966_v23 = vadd.f32 %v2704_v7, %v2292_v61  ;;  %v1957_v3 = vpop.f32.mrb[61].mxu1 }
 0x847   :  { %v1958_v13 = vadd.f32 %v2292_v61, %v1957_v3  ;;  %v2705_v42 = vpop.f32.mrb[62].mxu1 }
 0x848   :  { %v1969_v5 = vadd.f32 %v2705_v42, %v2292_v61  ;;  %v1960_v8 = vpop.f32.mrb[63].mxu1  ;;  %v1986_v57 = vmax.f32 %v1966_v23, 0.0 }
 0x849   :  { %v1961_v9 = vadd.f32 %v2292_v61, %v1960_v8  ;;  %v1984_v16 = vmax.f32 %v1958_v13, 0.0 }
 0x84a   :  { %v1987_v35 = vmax.f32 %v1969_v5, 0.0 }
 0x84b   :  { %v1985_v24 = vmax.f32 %v1961_v9, 0.0 }
 0x84c   :  { %v1995_v50 = vpack.c.bf16 %v1987_v35, %v1986_v57 }
 0x84d   :  { %v1994_v43 = vpack.c.bf16 %v1985_v24, %v1984_v16 }
 0x84f   :  { %2734 = vmatprep.mubr.bf16.mxu0 %v1994_v43 }
 0x850   :  { %2735 = vmatmul.mubr.bf16.gmra.mrb[76].mxu0 %v1995_v50 }
 0x8ff   :  { %v2724_v36 = vpop.f32.mrb[64].mxu0 }
 0x900   :  { %v2112_v59 = vadd.f32 %v2724_v36, %v2302_v2  ;;  %v2103_v44 = vpop.f32.mrb[65].mxu0 }
 0x901   :  { %v2104_v45 = vadd.f32 %v2302_v2, %v2103_v44  ;;  %v2725_v63 = vpop.f32.mrb[66].mxu0 }
 0x902   :  { %2313 = vst [vmem:[%s3557_s5 + $0x110] sm:$0xff] %v2112_v59  ;;  %v2115_v46 = vadd.f32 %v2725_v63, %v2302_v2  ;;  %v2106_v61 = vpop.f32.mrb[67].mxu0 }
 0x903   :  { %2311 = vst [vmem:[%s3557_s5 + $0x100] sm:$0xff] %v2104_v45  ;;  %v2107_v32 = vadd.f32 %v2302_v2, %v2106_v61 }
 0x904   :  { %2314 = vst [vmem:[%s3557_s5 + $0x118] sm:$0xff] %v2115_v46 }
 0x905   :  { %2312 = vst [vmem:[%s3557_s5 + $0x108] sm:$0xff] %v2107_v32 }
 0x90e   :  { %v2728_v15 = vpop.f32.mrb[68].mxu0 }
 0x90f   :  { %v2128_v12 = vadd.f32 %v2728_v15, %v2302_v2  ;;  %v2119_v10 = vpop.f32.mrb[69].mxu0 }
 0x910   :  { %v2120_v11 = vadd.f32 %v2302_v2, %v2119_v10  ;;  %v2729_v27 = vpop.f32.mrb[70].mxu0 }
 0x911   :  { %2317 = vst [vmem:[%s3557_s5 + $0x130] sm:$0xff] %v2128_v12  ;;  %v2131_v17 = vadd.f32 %v2729_v27, %v2302_v2  ;;  %v2122_v18 = vpop.f32.mrb[71].mxu0 }
 0x912   :  { %2315 = vst [vmem:[%s3557_s5 + $0x120] sm:$0xff] %v2120_v11  ;;  %v2123_v37 = vadd.f32 %v2302_v2, %v2122_v18 }
 0x913   :  { %2318 = vst [vmem:[%s3557_s5 + $0x138] sm:$0xff] %v2131_v17 }
 0x914   :  { %2316 = vst [vmem:[%s3557_s5 + $0x128] sm:$0xff] %v2123_v37 }
 0x916   :  { %v2732_v4 = vpop.f32.mrb[72].mxu0 }
 0x917   :  { %v2144_v19 = vadd.f32 %v2732_v4, %v2302_v2  ;;  %v2135_v29 = vpop.f32.mrb[73].mxu0 }
 0x918   :  { %v2136_v62 = vadd.f32 %v2302_v2, %v2135_v29  ;;  %v2733_v14 = vpop.f32.mrb[74].mxu0 }
 0x919   :  { %2321 = vst [vmem:[%s3557_s5 + $0x150] sm:$0xff] %v2144_v19  ;;  %v2147_v60 = vadd.f32 %v2733_v14, %v2302_v2  ;;  %v2138_v1 = vpop.f32.mrb[75].mxu0 }
 0x91a   :  { %2319 = vst [vmem:[%s3557_s5 + $0x140] sm:$0xff] %v2136_v62  ;;  %v2139_v25 = vadd.f32 %v2302_v2, %v2138_v1 }
 0x91b   :  { %2322 = vst [vmem:[%s3557_s5 + $0x158] sm:$0xff] %v2147_v60 }
 0x91c   :  { %2320 = vst [vmem:[%s3557_s5 + $0x148] sm:$0xff] %v2139_v25 }
 0x923   :  { %v2736_v28 = vpop.f32.mrb[76].mxu0 }
 0x924   :  { %v2160_v33 = vadd.f32 %v2736_v28, %v2302_v2  ;;  %v2151_v20 = vpop.f32.mrb[77].mxu0 }
 0x925   :  { %v2152_v0 = vadd.f32 %v2302_v2, %v2151_v20  ;;  %v2737_v38 = vpop.f32.mrb[78].mxu0 }
 0x926   :  { %2325 = vst [vmem:[%s3557_s5 + $0x170] sm:$0xff] %v2160_v33  ;;  %v2163_v39 = vadd.f32 %v2737_v38, %v2302_v2  ;;  %v2154_v40 = vpop.f32.mrb[79].mxu0 }
 0x927   :  { %2323 = vst [vmem:[%s3557_s5 + $0x160] sm:$0xff] %v2152_v0  ;;  %v2155_v41 = vadd.f32 %v2302_v2, %v2154_v40 }
 0x928   :  { %2326 = vst [vmem:[%s3557_s5 + $0x178] sm:$0xff] %v2163_v39 }
 0x929   :  { %2324 = vst [vmem:[%s3557_s5 + $0x168] sm:$0xff] %v2155_v41 }
 0x92a   :  { %2187 = vsyncpa [#allocation3], 1 }
 0x92b   :  { %2188 = vsyncpa [#allocation5], 1 }

</bundles_post_ra>
